<compile_context>
chip_gen: v7x
topology: tpu7x:2x2x1
jax: 0.10.0
libtpu: 0.0.40
codegen_flags: <defaults>
</compile_context>

<pallas_src>
import functools
import math

import jax
import jax.numpy as jnp
import numpy as np
from jax.experimental import pallas as pl
from jax.experimental.pallas import tpu as pltpu

_LANES = 128


# ----------------------------------------------------------------------------
# Fused kernel factory: one B_TILE image tile per grid step.
# Activation layout: (B_TILE * H, W*C) rows = b*H + h, cols = w*C + c.
# ----------------------------------------------------------------------------
def _make_vgg_kernel(meta, b_tile):
    convs = meta["convs"]
    fc = meta["fc"]
    B = b_tile

    def kernel(x_ref, w_ref, b_ref, o_ref, scr_ref):
        f32, bf16 = jnp.float32, jnp.bfloat16

        def dot_bf(a, wslab):
            # activation cast to bf16 exactly once (here), f32 MXU accumulation
            return jnp.dot(a.astype(bf16), wslab, preferred_element_type=f32)

        def conv3x3_relu(a, cfg):
            # a: (R, K) f32.  Vertical taps via sublane rolls + per-image masks;
            # horizontal taps + horizontal zero pad are folded into the banded
            # weight slabs (which also skip the un-compacted pool columns).
            R, K = a.shape
            h_img, k, off = cfg["h_img"], cfg["k"], cfg["off"]
            hpos = jax.lax.broadcasted_iota(jnp.int32, (R, K), 0) % h_img
            up = jnp.where(hpos != 0, pltpu.roll(a, shift=1, axis=0), 0.0)
            dn = jnp.where(hpos != h_img - 1,
                           pltpu.roll(a, shift=R - 1, axis=0), 0.0)
            acc = dot_bf(up, w_ref[off:off + k, :])
            acc = acc + dot_bf(a, w_ref[off + k:off + 2 * k, :])
            acc = acc + dot_bf(dn, w_ref[off + 2 * k:off + 3 * k, :])
            acc = acc + b_ref[cfg["bias"]:cfg["bias"] + 1, :]
            return jnp.maximum(acc, 0.0)

        def pool2x2(y, c):
            # vertical 2->1: max(row, row+1) via sublane roll, keep even rows
            # through a stride-2 VMEM read; horizontal 2->1: max(col, col+c)
            # via lane roll, NO compaction (next layer's banded weights only
            # read the even c-blocks, odd blocks get exactly-zero weights).
            R, N = y.shape
            vmax = jnp.maximum(y, pltpu.roll(y, shift=R - 1, axis=0))
            scr_ref[0:R, :] = vmax
            v = scr_ref[pl.ds(0, R // 2, 2), :]
            return jnp.maximum(v, pltpu.roll(v, shift=N - c, axis=1))

        # features[:-1]: conv-relu-pool, conv-relu-pool, conv-relu
        a = x_ref[...]                                    # (B*H0, W0*C0) f32
        for cfg in convs:
            a = conv3x3_relu(a, cfg)
            if cfg["pool"]:
                a = pool2x2(a, cfg["cout"])

        # classifier (Dropout = identity at inference).  NCHW flatten order is
        # folded into the fc1 weight; the per-image flatten is H3 strided row
        # gathers from VMEM, each feeding one accumulated (B, chunk) GEMM.
        hc, ch, hid = fc["h_img"], fc["chunk"], fc["hidden"]
        scr_ref[0:B * hc, :] = a
        z = jnp.zeros((B, hid), f32)
        for h in range(hc):
            chunk = scr_ref[pl.ds(h, B, hc), :]           # image-row h, all b
            z = z + dot_bf(chunk,
                           w_ref[fc["off1"] + h * ch:fc["off1"] + (h + 1) * ch, :])
        z = jnp.maximum(z + b_ref[fc["bias1"]:fc["bias1"] + 1, :], 0.0)
        z = jnp.maximum(dot_bf(z, w_ref[fc["off2"]:fc["off2"] + hid, :])
                        + b_ref[fc["bias2"]:fc["bias2"] + 1, :], 0.0)
        o_ref[...] = (dot_bf(z, w_ref[fc["off3"]:fc["off3"] + hid, :])
                      + b_ref[fc["bias3"]:fc["bias3"] + 1, :]).astype(o_ref.dtype)

    return kernel


# ----------------------------------------------------------------------------
# Host-side (one-time) parameter preparation
# ----------------------------------------------------------------------------
def _banded_conv_taps(w_pt, w_img, in_stride, in_cols):
    """Per vertical tap ki: a (in_cols, w_img*cout) matrix folding the three
    horizontal taps + horizontal zero padding.  Valid input data sits at
    columns (in_stride*w)*cin + c; all other columns get exactly-zero weights
    (this consumes the un-compacted horizontal maxpool for free)."""
    cout, cin, kh, kw = w_pt.shape
    assert (kh, kw) == (3, 3)
    assert (w_img - 1) * in_stride * cin + cin <= in_cols
    m = np.zeros((3, in_cols, w_img * cout), np.float32)
    for ki in range(3):
        for wo in range(w_img):
            for kj in range(3):
                wi = wo + kj - 1
                if 0 <= wi < w_img:
                    r0 = wi * in_stride * cin
                    m[ki, r0:r0 + cin, wo * cout:(wo + 1) * cout] = \
                        w_pt[:, :, ki, kj].T
    return m


def _fold_fc1(w_pt, H, W, C):
    """fc1 (out, C*H*W NCHW-flat) -> (H*W*C, out) for the kernel's HWC rows."""
    hidden = w_pt.shape[0]
    wk = w_pt.reshape(hidden, C, H, W).transpose(2, 3, 1, 0)   # (h, w, c, o)
    return np.ascontiguousarray(wk.reshape(H * W * C, hidden))


def prepare_kernel_params(params, in_ch, h0, w0, conv_channels, hidden,
                          num_classes):
    """Pack every weight into one bf16 blob and every bias into one f32 blob,
    plus a static meta dict of row offsets consumed by the kernel factory."""
    assert hidden == _LANES, "demo packs FC weights at 128 lanes"
    assert num_classes <= _LANES
    w_pieces, b_rows, convs_meta = [], [], []
    row = 0
    H, W, cols, stride, cin = h0, w0, w0 * in_ch, 1, in_ch
    pools = [True] * (len(conv_channels) - 1) + [False]        # features[:-1]
    for li, (cout, has_pool) in enumerate(zip(conv_channels, pools), start=1):
        wnp = np.asarray(params[f"conv{li}_w"], np.float32)
        bnp = np.asarray(params[f"conv{li}_b"], np.float32)
        out_cols = W * cout
        assert out_cols == _LANES, "demo assumes 128-lane conv outputs"
        taps = _banded_conv_taps(wnp, W, stride, cols)
        w_pieces.append(taps.reshape(3 * cols, out_cols))
        convs_meta.append(dict(off=row, k=cols, h_img=H, bias=len(b_rows),
                               cout=cout, pool=has_pool))
        row += 3 * cols
        b_rows.append(np.tile(bnp, W))
        if has_pool:
            assert H % 2 == 0 and W % 2 == 0
            H, W, stride = H // 2, W // 2, 2
        else:
            stride = 1
        cols, cin = out_cols, cout

    chunk = W * cin
    assert chunk == _LANES
    fc1 = np.asarray(params["fc1_w"], np.float32)
    assert fc1.shape == (hidden, cin * H * W), (fc1.shape, cin, H, W)
    w_pieces.append(_fold_fc1(fc1, H, W, cin))                 # (H*W*C, hidden)
    fc_meta = dict(off1=row, h_img=H, chunk=chunk, hidden=hidden,
                   bias1=len(b_rows))
    row += H * W * cin
    b_rows.append(np.asarray(params["fc1_b"], np.float32))

    w_pieces.append(np.asarray(params["fc2_w"], np.float32).T)
    fc_meta["off2"], fc_meta["bias2"] = row, len(b_rows)
    row += hidden
    b_rows.append(np.asarray(params["fc2_b"], np.float32))

    w3 = np.zeros((hidden, _LANES), np.float32)                # lane-dense pad
    w3[:, :num_classes] = np.asarray(params["fc3_w"], np.float32).T
    b3 = np.zeros((_LANES,), np.float32)
    b3[:num_classes] = np.asarray(params["fc3_b"], np.float32)
    w_pieces.append(w3)
    fc_meta["off3"], fc_meta["bias3"] = row, len(b_rows)
    row += hidden
    b_rows.append(b3)

    wblob = np.concatenate(w_pieces, axis=0)
    pad = (-wblob.shape[0]) % 8
    if pad:
        wblob = np.concatenate([wblob, np.zeros((pad, _LANES), np.float32)], 0)
    bblob = np.stack(b_rows, axis=0)
    bpad = (-bblob.shape[0]) % 8
    if bpad:
        bblob = np.concatenate([bblob, np.zeros((bpad, _LANES), np.float32)], 0)

    meta = dict(convs=convs_meta, fc=fc_meta, n_lanes=_LANES,
                num_classes=num_classes)
    return (jnp.asarray(wblob, jnp.bfloat16),
            jnp.asarray(bblob, jnp.float32),
            meta)


# ----------------------------------------------------------------------------
# Forward pass (mirrors VGG.forward: features -> flatten -> classifier)
# ----------------------------------------------------------------------------
def vgg_forward(x_nchw, wblob, bblob, *, meta, b_tile=8):
    n, c, h, w = x_nchw.shape
    lanes = meta["n_lanes"]
    assert (b_tile * h) % 8 == 0
    g = -(-n // b_tile)
    n_pad = g * b_tile

    # NHWC rows, lane-dense columns w*C + c; stack batch tile into sublanes.
    x = jnp.transpose(x_nchw, (0, 2, 3, 1)).reshape(n, h, w * c)
    if n_pad != n:
        x = jnp.pad(x, ((0, n_pad - n), (0, 0), (0, 0)))
    x2d = x.reshape(n_pad * h, w * c)

    kernel = _make_vgg_kernel(meta, b_tile)
    out = pl.pallas_call(
        kernel,
        grid=(g,),
        in_specs=[
            pl.BlockSpec((b_tile * h, w * c), lambda i: (i, 0)),
            pl.BlockSpec(wblob.shape, lambda i: (0, 0)),   # resident constants
            pl.BlockSpec(bblob.shape, lambda i: (0, 0)),
        ],
        out_specs=pl.BlockSpec((b_tile, lanes), lambda i: (i, 0)),
        out_shape=jax.ShapeDtypeStruct((n_pad, lanes), jnp.float32),
        scratch_shapes=[pltpu.VMEM((b_tile * h, lanes), jnp.float32)],
        compiler_params=pltpu.CompilerParams(
            dimension_semantics=("parallel",),             # megacore / 2-TC
            vmem_limit_bytes=32 * 1024 * 1024,
        ),
    )(x2d, wblob, bblob)
    return out[:n, :meta["num_classes"]]


# ----------------------------------------------------------------------------
# Parameter init (matches the PyTorch _initialize_weights rules, torch layouts)
# ----------------------------------------------------------------------------
def init_params(key, in_ch, conv_channels, hidden, num_classes, flat_dim):
    params = {}
    keys = jax.random.split(key, len(conv_channels) + 3)
    ki = 0
    cin = in_ch
    for li, cout in enumerate(conv_channels, start=1):
        std = math.sqrt(2.0 / (cout * 3 * 3))  # kaiming_normal_, fan_out, relu
        params[f"conv{li}_w"] = std * jax.random.normal(
            keys[ki], (cout, cin, 3, 3), jnp.float32)
        params[f"conv{li}_b"] = jnp.zeros((cout,), jnp.float32)
        ki += 1
        cin = cout
    fc_dims = [(hidden, flat_dim), (hidden, hidden), (num_classes, hidden)]
    for li, (dout, din) in enumerate(fc_dims, start=1):
        params[f"fc{li}_w"] = 0.01 * jax.random.normal(
            keys[ki], (dout, din), jnp.float32)
        params[f"fc{li}_b"] = jnp.zeros((dout,), jnp.float32)
        ki += 1
    return params


# ----------------------------------------------------------------------------
# Plain-JAX reference with matching mixed precision (bf16 operands, f32 acc,
# f32 bias/ReLU/maxpool) — used only for the self-check in __main__.
# ----------------------------------------------------------------------------
def vgg_reference(x_nchw, params):
    x = jnp.transpose(x_nchw, (0, 2, 3, 1))  # NHWC

    def conv_relu(x, w, b):
        n, hh, ww, _ = x.shape
        xr = x.astype(jnp.bfloat16)
        wr = w.astype(jnp.bfloat16)
        xp = jnp.pad(xr, ((0, 0), (1, 1), (1, 1), (0, 0)))
        acc = jnp.zeros((n, hh, ww, w.shape[0]), jnp.float32)
        for ki in range(3):
            for kj in range(3):
                acc = acc + jnp.einsum(
                    "nhwc,oc->nhwo", xp[:, ki:ki + hh, kj:kj + ww, :],
                    wr[:, :, ki, kj], preferred_element_type=jnp.float32)
        return jax.nn.relu(acc + b)

    def pool(x):  # f32 2x2 stride-2 maxpool
        return jnp.maximum(
            jnp.maximum(x[:, 0::2, 0::2, :], x[:, 0::2, 1::2, :]),
            jnp.maximum(x[:, 1::2, 0::2, :], x[:, 1::2, 1::2, :]))

    x = pool(conv_relu(x, params["conv1_w"], params["conv1_b"]))
    x = pool(conv_relu(x, params["conv2_w"], params["conv2_b"]))
    x = conv_relu(x, params["conv3_w"], params["conv3_b"])

    n = x.shape[0]
    flat = jnp.transpose(x, (0, 3, 1, 2)).reshape(n, -1)   # torch x.view(N,-1)

    def fc(x, w, b):
        return jnp.dot(x.astype(jnp.bfloat16), w.T.astype(jnp.bfloat16),
                       preferred_element_type=jnp.float32) + b

    x = jax.nn.relu(fc(flat, params["fc1_w"], params["fc1_b"]))
    x = jax.nn.relu(fc(x, params["fc2_w"], params["fc2_b"]))
    return fc(x, params["fc3_w"], params["fc3_b"])


if __name__ == "__main__":
    key = jax.random.PRNGKey(0)
    k_x, k_p = jax.random.split(key)

    B, C, H, W = 16, 4, 16, 16            # batch 16 -> grid=(2,) at B_TILE=8
    conv_channels = (8, 16, 32)
    hidden, num_classes = 128, 10
    flat_dim = conv_channels[-1] * (H // 4) * (W // 4)   # two 2x2 pools

    x = jax.random.normal(k_x, (B, C, H, W), jnp.float32)
    params = init_params(k_p, C, conv_channels, hidden, num_classes, flat_dim)
    wblob, bblob, meta = prepare_kernel_params(
        params, C, H, W, conv_channels, hidden, num_classes)

    fwd = jax.jit(functools.partial(vgg_forward, meta=meta, b_tile=8))
    out = fwd(x, wblob, bblob)
    jax.block_until_ready(out)
    assert out.shape == (B, num_classes), out.shape

    # Self-check against a plain-JAX reference with matching mixed precision.
    ref = jax.jit(vgg_reference)(x, params)
    jax.block_until_ready(ref)
    max_err = float(jnp.max(jnp.abs(out - ref)))
    assert jnp.allclose(out, ref, rtol=1e-2, atol=1e-3), max_err

    print("KERNEL_OK")
</pallas_src>

<mosaic_0001>
module attributes {stable_mosaic.version = 11 : i64} {
  func.func @kernel(%arg0: i32, %arg1: memref<128x64xf32, #tpu.memory_space<vmem>>, %arg2: memref<1728x128xbf16, #tpu.memory_space<vmem>>, %arg3: memref<8x128xf32, #tpu.memory_space<vmem>>, %arg4: memref<8x128xf32, #tpu.memory_space<vmem>>, %arg5: memref<128x128xf32, #tpu.memory_space<vmem>>) attributes {dimension_semantics = [#tpu.dimension_semantics<parallel>], iteration_bounds = array<i64: 2>, scalar_prefetch = 0 : i64, scratch_operands = 1 : i64, tpu.core_type = #tpu.core_type<tc>, window_params = [{transform_indices = @transform_0, window_bounds = array<i64: 128, 64>}, {pipeline_mode = #tpu.pipeline_mode<synchronous>, transform_indices = @transform_1, window_bounds = array<i64: 1728, 128>}, {pipeline_mode = #tpu.pipeline_mode<synchronous>, transform_indices = @transform_2, window_bounds = array<i64: 8, 128>}, {transform_indices = @transform_3, window_bounds = array<i64: 8, 128>}]} {
    %c0 = arith.constant 0 : index
    %c0_0 = arith.constant 0 : index
    %0 = vector.load %arg1[%c0, %c0_0] : memref<128x64xf32, #tpu.memory_space<vmem>>, vector<128x64xf32>
    %1 = tpu.iota {dimensions = array<i32: 0>} : vector<128x64xi32>
    %c16_i32 = arith.constant 16 : i32
    %c0_i32 = arith.constant 0 : i32
    %2 = arith.cmpi eq, %c16_i32, %c0_i32 : i32
    %c1_i32 = arith.constant 1 : i32
    %3 = arith.select %2, %c1_i32, %c16_i32 : i32
    %4 = vector.broadcast %3 : i32 to vector<128x64xi32>
    %5 = arith.remsi %1, %4 : vector<128x64xi32>
    %c0_i32_1 = arith.constant 0 : i32
    %6 = vector.broadcast %c0_i32_1 : i32 to vector<128x64xi32>
    %7 = arith.cmpi ne, %5, %6 : vector<128x64xi32>
    %c0_i32_2 = arith.constant 0 : i32
    %8 = vector.broadcast %c0_i32_2 : i32 to vector<128x64xi32>
    %9 = arith.cmpi slt, %5, %8 : vector<128x64xi32>
    %c0_i32_3 = arith.constant 0 : i32
    %10 = arith.cmpi slt, %3, %c0_i32_3 : i32
    %11 = vector.broadcast %10 : i1 to vector<128x64xi1>
    %12 = vector.broadcast %11 : vector<128x64xi1> to vector<128x64xi1>
    %13 = arith.xori %9, %12 : vector<128x64xi1>
    %14 = arith.andi %13, %7 : vector<128x64xi1>
    %15 = vector.broadcast %3 : i32 to vector<128x64xi32>
    %16 = arith.addi %5, %15 : vector<128x64xi32>
    %17 = arith.select %14, %16, %5 : vector<128x64xi1>, vector<128x64xi32>
    %c0_i32_4 = arith.constant 0 : i32
    %18 = vector.broadcast %c0_i32_4 : i32 to vector<128x64xi32>
    %19 = arith.cmpi ne, %17, %18 : vector<128x64xi32>
    %c1_i32_5 = arith.constant 1 : i32
    %20 = tpu.dynamic_rotate %0 by %c1_i32_5 dim 0 : vector<128x64xf32>, i32 -> vector<128x64xf32>
    %cst = arith.constant 0.000000e+00 : f32
    %21 = vector.broadcast %cst : f32 to vector<128x64xf32>
    %22 = arith.select %19, %20, %21 : vector<128x64xi1>, vector<128x64xf32>
    %c15_i32 = arith.constant 15 : i32
    %23 = vector.broadcast %c15_i32 : i32 to vector<128x64xi32>
    %24 = arith.cmpi ne, %17, %23 : vector<128x64xi32>
    %c127_i32 = arith.constant 127 : i32
    %25 = tpu.dynamic_rotate %0 by %c127_i32 dim 0 : vector<128x64xf32>, i32 -> vector<128x64xf32>
    %cst_6 = arith.constant 0.000000e+00 : f32
    %26 = vector.broadcast %cst_6 : f32 to vector<128x64xf32>
    %27 = arith.select %24, %25, %26 : vector<128x64xi1>, vector<128x64xf32>
    %c0_7 = arith.constant 0 : index
    %c0_8 = arith.constant 0 : index
    %28 = vector.load %arg2[%c0_7, %c0_8] : memref<1728x128xbf16, #tpu.memory_space<vmem>>, vector<64x128xbf16>
    %29 = arith.truncf %22 : vector<128x64xf32> to vector<128x64xbf16>
    %cst_9 = arith.constant dense<0.000000e+00> : vector<128x128xf32>
    %30 = tpu.matmul %29, %28, %cst_9 {dimension_numbers = #tpu.dot_dimension_numbers<[1], [0], [0], [1], [0, 0, 1, 1], [], []>} : vector<128x64xbf16>, vector<64x128xbf16>, vector<128x128xf32> -> vector<128x128xf32>
    %c64 = arith.constant 64 : index
    %c0_10 = arith.constant 0 : index
    %31 = vector.load %arg2[%c64, %c0_10] : memref<1728x128xbf16, #tpu.memory_space<vmem>>, vector<64x128xbf16>
    %32 = arith.truncf %0 : vector<128x64xf32> to vector<128x64xbf16>
    %cst_11 = arith.constant dense<0.000000e+00> : vector<128x128xf32>
    %33 = tpu.matmul %32, %31, %cst_11 {dimension_numbers = #tpu.dot_dimension_numbers<[1], [0], [0], [1], [0, 0, 1, 1], [], []>} : vector<128x64xbf16>, vector<64x128xbf16>, vector<128x128xf32> -> vector<128x128xf32>
    %34 = arith.addf %30, %33 : vector<128x128xf32>
    %c128 = arith.constant 128 : index
    %c0_12 = arith.constant 0 : index
    %35 = vector.load %arg2[%c128, %c0_12] : memref<1728x128xbf16, #tpu.memory_space<vmem>>, vector<64x128xbf16>
    %36 = arith.truncf %27 : vector<128x64xf32> to vector<128x64xbf16>
    %cst_13 = arith.constant dense<0.000000e+00> : vector<128x128xf32>
    %37 = tpu.matmul %36, %35, %cst_13 {dimension_numbers = #tpu.dot_dimension_numbers<[1], [0], [0], [1], [0, 0, 1, 1], [], []>} : vector<128x64xbf16>, vector<64x128xbf16>, vector<128x128xf32> -> vector<128x128xf32>
    %38 = arith.addf %34, %37 : vector<128x128xf32>
    %c0_14 = arith.constant 0 : index
    %c0_15 = arith.constant 0 : index
    %39 = vector.load %arg3[%c0_14, %c0_15] : memref<8x128xf32, #tpu.memory_space<vmem>>, vector<1x128xf32>
    %40 = vector.broadcast %39 : vector<1x128xf32> to vector<128x128xf32>
    %41 = arith.addf %38, %40 : vector<128x128xf32>
    %cst_16 = arith.constant 0.000000e+00 : f32
    %42 = vector.broadcast %cst_16 : f32 to vector<128x128xf32>
    %43 = arith.maximumf %41, %42 : vector<128x128xf32>
    %c127_i32_17 = arith.constant 127 : i32
    %44 = tpu.dynamic_rotate %43 by %c127_i32_17 dim 0 : vector<128x128xf32>, i32 -> vector<128x128xf32>
    %45 = arith.maximumf %43, %44 : vector<128x128xf32>
    %c0_18 = arith.constant 0 : index
    %c0_19 = arith.constant 0 : index
    %46 = vector.load %arg5[%c0_18, %c0_19] : memref<128x128xf32, #tpu.memory_space<vmem>>, vector<128x128xf32>
    tpu.vector_store %arg5[%c0_18, %c0_19], %45 {strides = array<i32>} : memref<128x128xf32, #tpu.memory_space<vmem>>, vector<128x128xf32>,
    %c0_20 = arith.constant 0 : index
    %c0_21 = arith.constant 0 : index
    %47 = tpu.strided_load %arg5[%c0_20, %c0_21] {strides = array<i32: 2, 1>} : memref<128x128xf32, #tpu.memory_space<vmem>>, vector<64x128xf32>
    %c120_i32 = arith.constant 120 : i32
    %48 = tpu.dynamic_rotate %47 by %c120_i32 dim 1 : vector<64x128xf32>, i32 -> vector<64x128xf32>
    %49 = arith.maximumf %47, %48 : vector<64x128xf32>
    %50 = tpu.iota {dimensions = array<i32: 0>} : vector<64x128xi32>
    %c8_i32 = arith.constant 8 : i32
    %c0_i32_22 = arith.constant 0 : i32
    %51 = arith.cmpi eq, %c8_i32, %c0_i32_22 : i32
    %c1_i32_23 = arith.constant 1 : i32
    %52 = arith.select %51, %c1_i32_23, %c8_i32 : i32
    %53 = vector.broadcast %52 : i32 to vector<64x128xi32>
    %54 = arith.remsi %50, %53 : vector<64x128xi32>
    %c0_i32_24 = arith.constant 0 : i32
    %55 = vector.broadcast %c0_i32_24 : i32 to vector<64x128xi32>
    %56 = arith.cmpi ne, %54, %55 : vector<64x128xi32>
    %c0_i32_25 = arith.constant 0 : i32
    %57 = vector.broadcast %c0_i32_25 : i32 to vector<64x128xi32>
    %58 = arith.cmpi slt, %54, %57 : vector<64x128xi32>
    %c0_i32_26 = arith.constant 0 : i32
    %59 = arith.cmpi slt, %52, %c0_i32_26 : i32
    %60 = vector.broadcast %59 : i1 to vector<64x128xi1>
    %61 = vector.broadcast %60 : vector<64x128xi1> to vector<64x128xi1>
    %62 = arith.xori %58, %61 : vector<64x128xi1>
    %63 = arith.andi %62, %56 : vector<64x128xi1>
    %64 = vector.broadcast %52 : i32 to vector<64x128xi32>
    %65 = arith.addi %54, %64 : vector<64x128xi32>
    %66 = arith.select %63, %65, %54 : vector<64x128xi1>, vector<64x128xi32>
    %c0_i32_27 = arith.constant 0 : i32
    %67 = vector.broadcast %c0_i32_27 : i32 to vector<64x128xi32>
    %68 = arith.cmpi ne, %66, %67 : vector<64x128xi32>
    %c1_i32_28 = arith.constant 1 : i32
    %69 = tpu.dynamic_rotate %49 by %c1_i32_28 dim 0 : vector<64x128xf32>, i32 -> vector<64x128xf32>
    %cst_29 = arith.constant 0.000000e+00 : f32
    %70 = vector.broadcast %cst_29 : f32 to vector<64x128xf32>
    %71 = arith.select %68, %69, %70 : vector<64x128xi1>, vector<64x128xf32>
    %c7_i32 = arith.constant 7 : i32
    %72 = vector.broadcast %c7_i32 : i32 to vector<64x128xi32>
    %73 = arith.cmpi ne, %66, %72 : vector<64x128xi32>
    %c63_i32 = arith.constant 63 : i32
    %74 = tpu.dynamic_rotate %49 by %c63_i32 dim 0 : vector<64x128xf32>, i32 -> vector<64x128xf32>
    %cst_30 = arith.constant 0.000000e+00 : f32
    %75 = vector.broadcast %cst_30 : f32 to vector<64x128xf32>
    %76 = arith.select %73, %74, %75 : vector<64x128xi1>, vector<64x128xf32>
    %c192 = arith.constant 192 : index
    %c0_31 = arith.constant 0 : index
    %77 = vector.load %arg2[%c192, %c0_31] : memref<1728x128xbf16, #tpu.memory_space<vmem>>, vector<128x128xbf16>
    %78 = arith.truncf %71 : vector<64x128xf32> to vector<64x128xbf16>
    %cst_32 = arith.constant dense<0.000000e+00> : vector<64x128xf32>
    %79 = tpu.matmul %78, %77, %cst_32 {dimension_numbers = #tpu.dot_dimension_numbers<[1], [0], [0], [1], [0, 0, 1, 1], [], []>} : vector<64x128xbf16>, vector<128x128xbf16>, vector<64x128xf32> -> vector<64x128xf32>
    %c320 = arith.constant 320 : index
    %c0_33 = arith.constant 0 : index
    %80 = vector.load %arg2[%c320, %c0_33] : memref<1728x128xbf16, #tpu.memory_space<vmem>>, vector<128x128xbf16>
    %81 = arith.truncf %49 : vector<64x128xf32> to vector<64x128xbf16>
    %cst_34 = arith.constant dense<0.000000e+00> : vector<64x128xf32>
    %82 = tpu.matmul %81, %80, %cst_34 {dimension_numbers = #tpu.dot_dimension_numbers<[1], [0], [0], [1], [0, 0, 1, 1], [], []>} : vector<64x128xbf16>, vector<128x128xbf16>, vector<64x128xf32> -> vector<64x128xf32>
    %83 = arith.addf %79, %82 : vector<64x128xf32>
    %c448 = arith.constant 448 : index
    %c0_35 = arith.constant 0 : index
    %84 = vector.load %arg2[%c448, %c0_35] : memref<1728x128xbf16, #tpu.memory_space<vmem>>, vector<128x128xbf16>
    %85 = arith.truncf %76 : vector<64x128xf32> to vector<64x128xbf16>
    %cst_36 = arith.constant dense<0.000000e+00> : vector<64x128xf32>
    %86 = tpu.matmul %85, %84, %cst_36 {dimension_numbers = #tpu.dot_dimension_numbers<[1], [0], [0], [1], [0, 0, 1, 1], [], []>} : vector<64x128xbf16>, vector<128x128xbf16>, vector<64x128xf32> -> vector<64x128xf32>
    %87 = arith.addf %83, %86 : vector<64x128xf32>
    %c1 = arith.constant 1 : index
    %c0_37 = arith.constant 0 : index
    %88 = vector.load %arg3[%c1, %c0_37] : memref<8x128xf32, #tpu.memory_space<vmem>>, vector<1x128xf32>
    %89 = vector.broadcast %88 : vector<1x128xf32> to vector<64x128xf32>
    %90 = arith.addf %87, %89 : vector<64x128xf32>
    %cst_38 = arith.constant 0.000000e+00 : f32
    %91 = vector.broadcast %cst_38 : f32 to vector<64x128xf32>
    %92 = arith.maximumf %90, %91 : vector<64x128xf32>
    %c63_i32_39 = arith.constant 63 : i32
    %93 = tpu.dynamic_rotate %92 by %c63_i32_39 dim 0 : vector<64x128xf32>, i32 -> vector<64x128xf32>
    %94 = arith.maximumf %92, %93 : vector<64x128xf32>
    %c0_40 = arith.constant 0 : index
    %c0_41 = arith.constant 0 : index
    %95 = vector.load %arg5[%c0_40, %c0_41] : memref<128x128xf32, #tpu.memory_space<vmem>>, vector<64x128xf32>
    tpu.vector_store %arg5[%c0_40, %c0_41], %94 {strides = array<i32>} : memref<128x128xf32, #tpu.memory_space<vmem>>, vector<64x128xf32>,
    %c0_42 = arith.constant 0 : index
    %c0_43 = arith.constant 0 : index
    %96 = tpu.strided_load %arg5[%c0_42, %c0_43] {strides = array<i32: 2, 1>} : memref<128x128xf32, #tpu.memory_space<vmem>>, vector<32x128xf32>
    %c112_i32 = arith.constant 112 : i32
    %97 = tpu.dynamic_rotate %96 by %c112_i32 dim 1 : vector<32x128xf32>, i32 -> vector<32x128xf32>
    %98 = arith.maximumf %96, %97 : vector<32x128xf32>
    %99 = tpu.iota {dimensions = array<i32: 0>} : vector<32x128xi32>
    %c4_i32 = arith.constant 4 : i32
    %c0_i32_44 = arith.constant 0 : i32
    %100 = arith.cmpi eq, %c4_i32, %c0_i32_44 : i32
    %c1_i32_45 = arith.constant 1 : i32
    %101 = arith.select %100, %c1_i32_45, %c4_i32 : i32
    %102 = vector.broadcast %101 : i32 to vector<32x128xi32>
    %103 = arith.remsi %99, %102 : vector<32x128xi32>
    %c0_i32_46 = arith.constant 0 : i32
    %104 = vector.broadcast %c0_i32_46 : i32 to vector<32x128xi32>
    %105 = arith.cmpi ne, %103, %104 : vector<32x128xi32>
    %c0_i32_47 = arith.constant 0 : i32
    %106 = vector.broadcast %c0_i32_47 : i32 to vector<32x128xi32>
    %107 = arith.cmpi slt, %103, %106 : vector<32x128xi32>
    %c0_i32_48 = arith.constant 0 : i32
    %108 = arith.cmpi slt, %101, %c0_i32_48 : i32
    %109 = vector.broadcast %108 : i1 to vector<32x128xi1>
    %110 = vector.broadcast %109 : vector<32x128xi1> to vector<32x128xi1>
    %111 = arith.xori %107, %110 : vector<32x128xi1>
    %112 = arith.andi %111, %105 : vector<32x128xi1>
    %113 = vector.broadcast %101 : i32 to vector<32x128xi32>
    %114 = arith.addi %103, %113 : vector<32x128xi32>
    %115 = arith.select %112, %114, %103 : vector<32x128xi1>, vector<32x128xi32>
    %c0_i32_49 = arith.constant 0 : i32
    %116 = vector.broadcast %c0_i32_49 : i32 to vector<32x128xi32>
    %117 = arith.cmpi ne, %115, %116 : vector<32x128xi32>
    %c1_i32_50 = arith.constant 1 : i32
    %118 = tpu.dynamic_rotate %98 by %c1_i32_50 dim 0 : vector<32x128xf32>, i32 -> vector<32x128xf32>
    %cst_51 = arith.constant 0.000000e+00 : f32
    %119 = vector.broadcast %cst_51 : f32 to vector<32x128xf32>
    %120 = arith.select %117, %118, %119 : vector<32x128xi1>, vector<32x128xf32>
    %c3_i32 = arith.constant 3 : i32
    %121 = vector.broadcast %c3_i32 : i32 to vector<32x128xi32>
    %122 = arith.cmpi ne, %115, %121 : vector<32x128xi32>
    %c31_i32 = arith.constant 31 : i32
    %123 = tpu.dynamic_rotate %98 by %c31_i32 dim 0 : vector<32x128xf32>, i32 -> vector<32x128xf32>
    %cst_52 = arith.constant 0.000000e+00 : f32
    %124 = vector.broadcast %cst_52 : f32 to vector<32x128xf32>
    %125 = arith.select %122, %123, %124 : vector<32x128xi1>, vector<32x128xf32>
    %c576 = arith.constant 576 : index
    %c0_53 = arith.constant 0 : index
    %126 = vector.load %arg2[%c576, %c0_53] : memref<1728x128xbf16, #tpu.memory_space<vmem>>, vector<128x128xbf16>
    %127 = arith.truncf %120 : vector<32x128xf32> to vector<32x128xbf16>
    %cst_54 = arith.constant dense<0.000000e+00> : vector<32x128xf32>
    %128 = tpu.matmul %127, %126, %cst_54 {dimension_numbers = #tpu.dot_dimension_numbers<[1], [0], [0], [1], [0, 0, 1, 1], [], []>} : vector<32x128xbf16>, vector<128x128xbf16>, vector<32x128xf32> -> vector<32x128xf32>
    %c704 = arith.constant 704 : index
    %c0_55 = arith.constant 0 : index
    %129 = vector.load %arg2[%c704, %c0_55] : memref<1728x128xbf16, #tpu.memory_space<vmem>>, vector<128x128xbf16>
    %130 = arith.truncf %98 : vector<32x128xf32> to vector<32x128xbf16>
    %cst_56 = arith.constant dense<0.000000e+00> : vector<32x128xf32>
    %131 = tpu.matmul %130, %129, %cst_56 {dimension_numbers = #tpu.dot_dimension_numbers<[1], [0], [0], [1], [0, 0, 1, 1], [], []>} : vector<32x128xbf16>, vector<128x128xbf16>, vector<32x128xf32> -> vector<32x128xf32>
    %132 = arith.addf %128, %131 : vector<32x128xf32>
    %c832 = arith.constant 832 : index
    %c0_57 = arith.constant 0 : index
    %133 = vector.load %arg2[%c832, %c0_57] : memref<1728x128xbf16, #tpu.memory_space<vmem>>, vector<128x128xbf16>
    %134 = arith.truncf %125 : vector<32x128xf32> to vector<32x128xbf16>
    %cst_58 = arith.constant dense<0.000000e+00> : vector<32x128xf32>
    %135 = tpu.matmul %134, %133, %cst_58 {dimension_numbers = #tpu.dot_dimension_numbers<[1], [0], [0], [1], [0, 0, 1, 1], [], []>} : vector<32x128xbf16>, vector<128x128xbf16>, vector<32x128xf32> -> vector<32x128xf32>
    %136 = arith.addf %132, %135 : vector<32x128xf32>
    %c2 = arith.constant 2 : index
    %c0_59 = arith.constant 0 : index
    %137 = vector.load %arg3[%c2, %c0_59] : memref<8x128xf32, #tpu.memory_space<vmem>>, vector<1x128xf32>
    %138 = vector.broadcast %137 : vector<1x128xf32> to vector<32x128xf32>
    %139 = arith.addf %136, %138 : vector<32x128xf32>
    %cst_60 = arith.constant 0.000000e+00 : f32
    %140 = vector.broadcast %cst_60 : f32 to vector<32x128xf32>
    %141 = arith.maximumf %139, %140 : vector<32x128xf32>
    %c0_61 = arith.constant 0 : index
    %c0_62 = arith.constant 0 : index
    %142 = vector.load %arg5[%c0_61, %c0_62] : memref<128x128xf32, #tpu.memory_space<vmem>>, vector<32x128xf32>
    tpu.vector_store %arg5[%c0_61, %c0_62], %141 {strides = array<i32>} : memref<128x128xf32, #tpu.memory_space<vmem>>, vector<32x128xf32>,
    %cst_63 = arith.constant 0.000000e+00 : f32
    %143 = vector.broadcast %cst_63 : f32 to vector<8x128xf32>
    %c0_64 = arith.constant 0 : index
    %c0_65 = arith.constant 0 : index
    %144 = tpu.strided_load %arg5[%c0_64, %c0_65] {strides = array<i32: 4, 1>} : memref<128x128xf32, #tpu.memory_space<vmem>>, vector<8x128xf32>
    %c960 = arith.constant 960 : index
    %c0_66 = arith.constant 0 : index
    %145 = vector.load %arg2[%c960, %c0_66] : memref<1728x128xbf16, #tpu.memory_space<vmem>>, vector<128x128xbf16>
    %146 = arith.truncf %144 : vector<8x128xf32> to vector<8x128xbf16>
    %cst_67 = arith.constant dense<0.000000e+00> : vector<8x128xf32>
    %147 = tpu.matmul %146, %145, %cst_67 {dimension_numbers = #tpu.dot_dimension_numbers<[1], [0], [0], [1], [0, 0, 1, 1], [], []>} : vector<8x128xbf16>, vector<128x128xbf16>, vector<8x128xf32> -> vector<8x128xf32>
    %148 = arith.addf %143, %147 : vector<8x128xf32>
    %c1_68 = arith.constant 1 : index
    %c0_69 = arith.constant 0 : index
    %149 = tpu.strided_load %arg5[%c1_68, %c0_69] {strides = array<i32: 4, 1>} : memref<128x128xf32, #tpu.memory_space<vmem>>, vector<8x128xf32>
    %c1088 = arith.constant 1088 : index
    %c0_70 = arith.constant 0 : index
    %150 = vector.load %arg2[%c1088, %c0_70] : memref<1728x128xbf16, #tpu.memory_space<vmem>>, vector<128x128xbf16>
    %151 = arith.truncf %149 : vector<8x128xf32> to vector<8x128xbf16>
    %cst_71 = arith.constant dense<0.000000e+00> : vector<8x128xf32>
    %152 = tpu.matmul %151, %150, %cst_71 {dimension_numbers = #tpu.dot_dimension_numbers<[1], [0], [0], [1], [0, 0, 1, 1], [], []>} : vector<8x128xbf16>, vector<128x128xbf16>, vector<8x128xf32> -> vector<8x128xf32>
    %153 = arith.addf %148, %152 : vector<8x128xf32>
    %c2_72 = arith.constant 2 : index
    %c0_73 = arith.constant 0 : index
    %154 = tpu.strided_load %arg5[%c2_72, %c0_73] {strides = array<i32: 4, 1>} : memref<128x128xf32, #tpu.memory_space<vmem>>, vector<8x128xf32>
    %c1216 = arith.constant 1216 : index
    %c0_74 = arith.constant 0 : index
    %155 = vector.load %arg2[%c1216, %c0_74] : memref<1728x128xbf16, #tpu.memory_space<vmem>>, vector<128x128xbf16>
    %156 = arith.truncf %154 : vector<8x128xf32> to vector<8x128xbf16>
    %cst_75 = arith.constant dense<0.000000e+00> : vector<8x128xf32>
    %157 = tpu.matmul %156, %155, %cst_75 {dimension_numbers = #tpu.dot_dimension_numbers<[1], [0], [0], [1], [0, 0, 1, 1], [], []>} : vector<8x128xbf16>, vector<128x128xbf16>, vector<8x128xf32> -> vector<8x128xf32>
    %158 = arith.addf %153, %157 : vector<8x128xf32>
    %c3 = arith.constant 3 : index
    %c0_76 = arith.constant 0 : index
    %159 = tpu.strided_load %arg5[%c3, %c0_76] {strides = array<i32: 4, 1>} : memref<128x128xf32, #tpu.memory_space<vmem>>, vector<8x128xf32>
    %c1344 = arith.constant 1344 : index
    %c0_77 = arith.constant 0 : index
    %160 = vector.load %arg2[%c1344, %c0_77] : memref<1728x128xbf16, #tpu.memory_space<vmem>>, vector<128x128xbf16>
    %161 = arith.truncf %159 : vector<8x128xf32> to vector<8x128xbf16>
    %cst_78 = arith.constant dense<0.000000e+00> : vector<8x128xf32>
    %162 = tpu.matmul %161, %160, %cst_78 {dimension_numbers = #tpu.dot_dimension_numbers<[1], [0], [0], [1], [0, 0, 1, 1], [], []>} : vector<8x128xbf16>, vector<128x128xbf16>, vector<8x128xf32> -> vector<8x128xf32>
    %163 = arith.addf %158, %162 : vector<8x128xf32>
    %c3_79 = arith.constant 3 : index
    %c0_80 = arith.constant 0 : index
    %164 = vector.load %arg3[%c3_79, %c0_80] : memref<8x128xf32, #tpu.memory_space<vmem>>, vector<1x128xf32>
    %165 = vector.broadcast %164 : vector<1x128xf32> to vector<8x128xf32>
    %166 = arith.addf %163, %165 : vector<8x128xf32>
    %cst_81 = arith.constant 0.000000e+00 : f32
    %167 = vector.broadcast %cst_81 : f32 to vector<8x128xf32>
    %168 = arith.maximumf %166, %167 : vector<8x128xf32>
    %c1472 = arith.constant 1472 : index
    %c0_82 = arith.constant 0 : index
    %169 = vector.load %arg2[%c1472, %c0_82] : memref<1728x128xbf16, #tpu.memory_space<vmem>>, vector<128x128xbf16>
    %170 = arith.truncf %168 : vector<8x128xf32> to vector<8x128xbf16>
    %cst_83 = arith.constant dense<0.000000e+00> : vector<8x128xf32>
    %171 = tpu.matmul %170, %169, %cst_83 {dimension_numbers = #tpu.dot_dimension_numbers<[1], [0], [0], [1], [0, 0, 1, 1], [], []>} : vector<8x128xbf16>, vector<128x128xbf16>, vector<8x128xf32> -> vector<8x128xf32>
    %c4 = arith.constant 4 : index
    %c0_84 = arith.constant 0 : index
    %172 = vector.load %arg3[%c4, %c0_84] : memref<8x128xf32, #tpu.memory_space<vmem>>, vector<1x128xf32>
    %173 = vector.broadcast %172 : vector<1x128xf32> to vector<8x128xf32>
    %174 = arith.addf %171, %173 : vector<8x128xf32>
    %cst_85 = arith.constant 0.000000e+00 : f32
    %175 = vector.broadcast %cst_85 : f32 to vector<8x128xf32>
    %176 = arith.maximumf %174, %175 : vector<8x128xf32>
    %c1600 = arith.constant 1600 : index
    %c0_86 = arith.constant 0 : index
    %177 = vector.load %arg2[%c1600, %c0_86] : memref<1728x128xbf16, #tpu.memory_space<vmem>>, vector<128x128xbf16>
    %178 = arith.truncf %176 : vector<8x128xf32> to vector<8x128xbf16>
    %cst_87 = arith.constant dense<0.000000e+00> : vector<8x128xf32>
    %179 = tpu.matmul %178, %177, %cst_87 {dimension_numbers = #tpu.dot_dimension_numbers<[1], [0], [0], [1], [0, 0, 1, 1], [], []>} : vector<8x128xbf16>, vector<128x128xbf16>, vector<8x128xf32> -> vector<8x128xf32>
    %c5 = arith.constant 5 : index
    %c0_88 = arith.constant 0 : index
    %180 = vector.load %arg3[%c5, %c0_88] : memref<8x128xf32, #tpu.memory_space<vmem>>, vector<1x128xf32>
    %181 = vector.broadcast %180 : vector<1x128xf32> to vector<8x128xf32>
    %182 = arith.addf %179, %181 : vector<8x128xf32>
    %c0_89 = arith.constant 0 : index
    %c0_90 = arith.constant 0 : index
    %183 = vector.load %arg4[%c0_89, %c0_90] : memref<8x128xf32, #tpu.memory_space<vmem>>, vector<8x128xf32>
    tpu.vector_store %arg4[%c0_89, %c0_90], %182 {strides = array<i32>} : memref<8x128xf32, #tpu.memory_space<vmem>>, vector<8x128xf32>,
    return
  }
  func.func @transform_0(%arg0: i32) -> (i32, i32) {
    %c0_i32 = arith.constant 0 : i32
    %c0_i32_0 = arith.constant 0 : i32
    return %arg0, %c0_i32 : i32, i32
  }
  func.func @transform_1(%arg0: i32) -> (i32, i32) {
    %c0_i32 = arith.constant 0 : i32
    %c0_i32_0 = arith.constant 0 : i32
    %c0_i32_1 = arith.constant 0 : i32
    return %c0_i32, %c0_i32_0 : i32, i32
  }
  func.func @transform_2(%arg0: i32) -> (i32, i32) {
    %c0_i32 = arith.constant 0 : i32
    %c0_i32_0 = arith.constant 0 : i32
    %c0_i32_1 = arith.constant 0 : i32
    return %c0_i32, %c0_i32_0 : i32, i32
  }
  func.func @transform_3(%arg0: i32) -> (i32, i32) {
    %c0_i32 = arith.constant 0 : i32
    %c0_i32_0 = arith.constant 0 : i32
    return %arg0, %c0_i32 : i32, i32
  }
}

</mosaic_0001>

<bundles_post_ra>
// kernel: vgg_forward.1
= control target key start
LH: loop header
LB: loop body
LE: loop exit
PB: predicated region body
PF: predicated region fallthrough
CT: control target
= control target key end

     0   :  { %8 = vsyncpa [#allocation4], 0  ;;  %s5225_s0 = inlined_call_operand.vmem [shape: f32[256,64], index: 0, kind: input, shape index: {}]   ;;  %s5226_s1 = inlined_call_operand.vmem [shape: bf16[1728,128], index: 1, kind: input, shape index: {}]   ;;  %s5227_s2 = inlined_call_operand.vmem [shape: f32[8,128], index: 2, kind: input, shape index: {}]   ;;  %s5228_s3 = inlined_call_operand.hbm [shape: f32[16,128], index: 3, kind: output, shape index: {}]  }
   0x1   :  { %10 = vsyncpa [#allocation4 + $0x1], 0  ;;  %s3974_s12 = smov 0   ;;  %s3976_s13 = smov 0  }
   0x2   :  { %s3978_s14 = smov 0   ;;  %s3980_s15 = smov 0  }
   0x3 LB: > { %s3995_s16 = sadd.s32 4294967295, %s3947_s15   ;;  %s2983_s17 = sadd.s32 4294967294, %s3947_s15   ;;  %s3947_s15 = sphi %s3980_s15, %s5324_s15   ;;  %s3943_s14 = sphi %s3978_s14, %s5323_s14   ;;  %s3939_s13 = sphi %s3976_s13, %s5322_s13   ;;  %s3935_s12 = sphi %s3974_s12, %s5321_s12  }
   0x4   : > { %s3999_s18 = sadd.s32 1, %s3947_s15   ;;  %s91_s19 = sadd.s32 1, %s3943_s14 }
   0x5   : > { %s88_s20 = ssub.s32 %s3947_s15, %s3999_s18  ;;  %p101_p0 = scmp.ne.s32.totalorder %s3943_s14, %s3939_s13 }
   0x6   : > { %p89_p1 = scmp.eq.s32.totalorder %s88_s20, 0  ;;  %p102_p2 = scmp.eq.s32.totalorder %s3995_s16, 1 }
   0x7   : > { %p107_p3 = scmp.ne.s32.totalorder %s3939_s13, %s3935_s12  ;;  %p108_p4 = scmp.eq.s32.totalorder %s2983_s17, 1 }
   0x8   : > { %s4010_s21 = scalar_select %p89_p1, %s3943_s14, %s91_s19  }
   0x9   : > { %p4012_p5 = por %p102_p2, %p101_p0  ;;  %p4016_p6 = por %p108_p4, %p107_p3 }
   0xa   : > { %p2986_p7 = scmp.ge.s32.totalorder %s3947_s15, 1  ;;  %p141_p8 = scmp.lt.s32.totalorder %s3947_s15, 3 }
   0xc   : > { %p142_p9 = pnand %p2986_p7, %p141_p8 }
   0xd   : > { %v3777_v0 = vld [vmem:[%s5226_s1 + $0x20] sm:$0xff] (!%p142_p9)   ;;  %s2988_s26 = sshll.u32 (!%p142_p9), %s3995_s16, 4  ;;  %v188_v1 = vlaneseq (!%p142_p9)  ;;  %v3778_v2 = vld [vmem:[%s5226_s1 + $0x28] sm:$0xff] (!%p142_p9)   ;;  %v3779_v3 = vld [vmem:[%s5226_s1 + $0x30] sm:$0xff] (!%p142_p9)   ;;  %vm583_vm0 = vcmask (!%p142_p9), 523264   ;;  %s3949_s10 = smov (!%p142_p9), 120  }
   0xe   : > { %145 = sbr.rel (%p142_p9) target bundleno = 1915 (0x77b), region = 32  ;;  %p166_p10 = scmp.lt.s32.totalorder (!%p142_p9), %s2988_s26, 31  ;;  %3324 = vmatprep.subr.bf16.mxu0 (!%p142_p9), %v3777_v0  ;;  %v3780_v8 = vld [vmem:[%s5226_s1 + $0x38] sm:$0xff] (!%p142_p9)   ;;  %v3781_v16 = vld [vmem:[%s5226_s1] sm:$0xff] (!%p142_p9)   ;;  %v3782_v33 = vld [vmem:[%s5226_s1 + $0x8] sm:$0xff] (!%p142_p9)  }
   0xf   : > { %3325 = vmatpush3.bf16.msra.mxu0 (!%p142_p9), %v3777_v0  ;;  %v4032_v4 = vshrl.u32 (!%p142_p9), %v188_v1, 7  ;;  %v3783_v53 = vld [vmem:[%s5226_s1 + $0x10] sm:$0xff] (!%p142_p9)   ;;  %s162_s20 = sand.u32 (!%p142_p9), 1, %s3939_s13   ;;  %s3165_s27 = sshll.u32 (!%p142_p9), %s3995_s16, 7 }
  0x10   : > { %3326 = vmatprep.subr.bf16.mxu0 (!%p142_p9), %v3778_v2  ;;  %s2987_s24 = sshll.u32 (!%p142_p9), %s162_s20, 3  ;;  %s5183_s5 = scalar_lea.hbm (!%p142_p9), %s5228_s3, %s3165_s27 }
  0x11   : > { %v4040_v5 = vadd.s32 (!%p142_p9), 16, %v4032_v4  ;;  %v4055_v10 = vadd.s32 (!%p142_p9), 24, %v4032_v4  ;;  %vm429_vm1 = vcmp.lt.s32.totalorder (!%p142_p9), %v4032_v4, 1  ;;  %vm494_vm2 = vcmp.lt.s32.totalorder (!%p142_p9), %v4032_v4, 7  ;;  %s164_s28 = scalar_lea.vmem (!%p142_p9), [#allocation3], %s2987_s24  ;;  %s2911_s6 = scalar_lea.sflag (!%p142_p9), [#allocation4], %s162_s20 }
  0x12   : > { %v209_v17 = vand.u32 (!%p142_p9), 15, %v4032_v4  ;;  %v4081_v22 = vadd.s32 (!%p142_p9), 32, %v4032_v4  ;;  %v4084_v23 = vadd.s32 (!%p142_p9), 48, %v4032_v4  ;;  %v199_v28 = vadd.s32 (!%p142_p9), 80, %v4032_v4  ;;  %s2924_s29 = sshll.u32 (!%p142_p9), %s164_s28, 4  ;;  %s5185_s29 = int_to_ptr.vmem [resolvable:$true] %s2924_s29 }
  0x13   : > { %3327 = vmatpush3.bf16.msra.mxu0 (!%p142_p9), %v3778_v2  ;;  %v223_v13 = vand.u32 (!%p142_p9), 15, %v4040_v5  ;;  %v230_v21 = vand.u32 (!%p142_p9), 15, %v4055_v10  ;;  %v203_v55 = vadd.s32 (!%p142_p9), 112, %v4032_v4  ;;  %s3885_s16 = scalar_lea.vmem (!%p142_p9), %s5185_s29, 128 }
  0x14   : > { %3328 = vmatprep.subr.bf16.mxu0 (!%p142_p9), %v3779_v3  ;;  %vm4195_vm5 = vcmp.ne.s32.totalorder (!%p142_p9), %v209_v17, 0  ;;  %v201_v17 = vadd.s32 (!%p142_p9), 96, %v4032_v4  ;;  %v279_v39 = vand.u32 (!%p142_p9), 15, %v199_v28  ;;  %p3886_p11 = scmp.ne.s32.totalorder (!%p142_p9), %s5185_s29, %s3885_s16 }
  0x15   : > { %s5326_s26 = smov (!%p166_p10, %s2988_s26), 31  ;;  %vm4087_vm3 = vcmp.ne.s32.totalorder %v223_v13, 0  ;;  %vm4127_vm4 = vcmp.ne.s32.totalorder %v230_v21, 15  ;;  %v4236_v21 = vadd.s32 8, %v4032_v4  ;;  %v307_v63 = vand.u32 15, %v203_v55 }
  0x16   : > { %s2989_s4 = sshll.u32 %s5326_s26, 3  ;;  %vm4284_vm9 = vcmp.ne.s32.totalorder %v279_v39, 0  ;;  %p3887_p12 = pnand %p3886_p11, %p4012_p5 }
  0x17   : > { %s4037_s7 = scalar_lea.vmem %s5225_s0, %s2989_s4  ;;  %3329 = vmatpush3.bf16.msra.mxu0 %v3779_v3  ;;  %v216_v57 = vand.u32 15, %v4236_v21  ;;  %vm4309_vm11 = vcmp.ne.s32.totalorder %v307_v63, 0 }
  0x18   : > { %v4043_v6 = vld [vmem:[%s4037_s7] sm:$0xff]  ;;  %v4046_v7 = vld [vmem:[%s4037_s7 + $0x8] sm:$0xff]  ;;  %v4052_v9 = vld [vmem:[%s4037_s7 + $0x10] sm:$0xff]  ;;  %3330 = vmatprep.subr.bf16.mxu0 %v3780_v8  ;;  %p3888_p13 = pneg %p3887_p12 }
  0x19   : > { %v414_v11 = vrot.slane %v4046_v7, 7  ;;  %v551_v12 = vpack.c.bf16 %v4046_v7, %v4043_v6  ;;  %v5232_v14 = vrot.slane %v4052_v9, 7  ;;  %v4065_v15 = vld [vmem:[%s4037_s7 + $0x18] sm:$0xff]  ;;  %v4074_v19 = vld [vmem:[%s4037_s7 + $0x20] sm:$0xff]  ;;  %v4077_v20 = vld [vmem:[%s4037_s7 + $0x28] sm:$0xff]  ;;  %v413_v24 = vrot.slane %v4043_v6, 7 }
  0x1a   : > { %v5230_v18 = vrot.slane %v4065_v15, 1  ;;  %v5229_v27 = vrot.slane %v4074_v19, 1  ;;  %v479_v29 = vrot.slane %v4046_v7, 1  ;;  %v552_v30 = vpack.c.bf16 %v4065_v15, %v4052_v9  ;;  %v4105_v31 = vld [vmem:[%s4037_s7 + $0x30] sm:$0xff]  ;;  %v4108_v32 = vld [vmem:[%s4037_s7 + $0x38] sm:$0xff]  ;;  %v4118_v37 = vld [vmem:[%s4037_s7 + $0x40] sm:$0xff] }
  0x1b   : > { %3332 = vmatprep.mubr.msk.bf16.mxu0 %vm583_vm0, %v551_v12  ;;  %v4097_v26 = vsel %vm429_vm1, %v414_v11, %v5232_v14  ;;  %3331 = vmatpush3.bf16.msra.mxu0 %v3780_v8  ;;  %v5234_v34 = vrot.slane %v4065_v15, 7  ;;  %v480_v35 = vrot.slane %v4052_v9, 1  ;;  %v553_v36 = vpack.c.bf16 %v4077_v20, %v4074_v19  ;;  %v4121_v38 = vld [vmem:[%s4037_s7 + $0x48] sm:$0xff]  ;;  %v4140_v43 = vld [vmem:[%s4037_s7 + $0x50] sm:$0xff]  ;;  %v4147_v48 = vld [vmem:[%s4037_s7 + $0x58] sm:$0xff] }
  0x1c   : > { %3348 = vmatprep.subr.bf16.mxu0 %v3781_v16  ;;  %v5233_v40 = vrot.slane %v4074_v19, 7  ;;  %v4137_v42 = vsel %vm494_vm2, %v5230_v18, %v5229_v27  ;;  %v418_v44 = vrot.slane %v4077_v20, 7  ;;  %v483_v45 = vrot.slane %v4077_v20, 1  ;;  %v4158_v54 = vld [vmem:[%s4037_s7 + $0x78] sm:$0xff]  ;;  %v4168_v59 = vld [vmem:[%s4037_s7 + $0x60] sm:$0xff]  ;;  %v4171_v60 = vld [vmem:[%s4037_s7 + $0x68] sm:$0xff] }
  0x1d   : > { %v5235_v46 = vrot.slane %v4105_v31, 7  ;;  %v420_v47 = vrot.slane %v4108_v32, 7  ;;  %v484_v49 = vrot.slane %v4105_v31, 1  ;;  %v485_v50 = vrot.slane %v4108_v32, 1  ;;  %v4177_v0 = vld [vmem:[%s4037_s7 + $0x70] sm:$0xff]  ;;  %v3784_v12 = vld [vmem:[%s5226_s1 + $0x18] sm:$0xff]  }
  0x1e   : > { %3333 = vmatmul.mubr.msk.bf16.vlgmr.msra.gmra.mrb[0].mxu0 %vm583_vm0, %v552_v30  ;;  %v421_v51 = vrot.slane %v4118_v37, 7  ;;  %v422_v52 = vrot.slane %v4121_v38, 7  ;;  %v5242_v56 = vrot.slane %v4118_v37, 1  ;;  %v5239_v58 = vrot.slane %v4140_v43, 7  ;;  %v4218_v14 = vld [vmem:[%s5226_s1 + $0x40] sm:$0xff]   ;;  %s3950_s7 = smov 112  }
  0x1f   : > { %3349 = vmatpush3.bf16.msra.mxu0 %v3781_v16  ;;  %3336 = vmatprep.mubr.msk.bf16.mxu0 %vm583_vm0, %v553_v36  ;;  %v5240_v61 = vrot.slane %v4147_v48, 7  ;;  %v5241_v62 = vrot.slane %v4140_v43, 1  ;;  %v5231_v1 = vrot.slane %v4158_v54, 7  ;;  %v554_v2 = vpack.c.bf16 %v4108_v32, %v4105_v31 }
  0x20   : > { %3350 = vmatprep.subr.bf16.mxu0 %v3782_v33  ;;  %v5236_v3 = vrot.slane %v4168_v59, 7  ;;  %v5238_v8 = vrot.slane %v4171_v60, 7  ;;  %v555_v13 = vpack.c.bf16 %v4121_v38, %v4118_v37  ;;  %v5237_v30 = vrot.slane %v4177_v0, 7 }
  0x21   : > { %v237_v36 = vand.u32 15, %v4081_v22  ;;  %v251_v27 = vand.u32 15, %v4084_v23  ;;  %v197_v18 = vadd.s32 64, %v4032_v4  ;;  %v558_v16 = vpack.c.bf16 %v4158_v54, %v4177_v0 }
  0x22   : > { %v444_v39 = vsel %vm429_vm1, %v413_v24, %v414_v11  ;;  %v4320_v11 = vsel %vm429_vm1, %v5238_v8, %v5237_v30  ;;  %vm4322_vm12 = vcmp.ne.s32.totalorder %v216_v57, 15  ;;  %v4332_v63 = vsel %vm494_vm2, %v479_v29, %v480_v35 }
  0x23   : > { %3351 = vmatpush3.bf16.msra.mxu0 %v3782_v33  ;;  %v445_v33 = vsel %vm429_vm1, %v5231_v1, %v413_v24  ;;  %vm4220_vm6 = vcmp.ne.s32.totalorder %v237_v36, 0  ;;  %vm4238_vm7 = vcmp.ne.s32.totalorder %v251_v27, 0  ;;  %v198_v36 = vadd.s32 72, %v4032_v4 }
  0x24   : > { %3352 = vmatprep.subr.bf16.mxu0 %v3783_v53  ;;  %v446_v1 = vsel %vm4195_vm5, %v445_v33, 0.0  ;;  %v265_v33 = vand.u32 15, %v197_v18  ;;  %v557_v18 = vpack.c.bf16 %v4171_v60, %v4168_v59  ;;  %v200_v8 = vadd.s32 88, %v4032_v4 }
  0x25   : > { %v272_v30 = vand.u32 15, %v198_v36  ;;  %v3787_v36 = vld [vmem:[%s5226_s1 + $0x50] sm:$0xff]   ;;  %v5284_v25 = vrot.slane %v4105_v31, 7  ;;  %v5286_v24 = vrot.slane %v4140_v43, 7  ;;  %v5293_v7 = vrot.slane %v4074_v19, 1 }
  0x26   : > { %3337 = vmatmul.mubr.msk.bf16.gmra.mrb[4].mxu0 %vm583_vm0, %v554_v2  ;;  %vm4265_vm8 = vcmp.ne.s32.totalorder %v265_v33, 0  ;;  %v4281_v2 = vsel %vm429_vm1, %v422_v52, %v5239_v58  ;;  %v4294_v33 = vadd.s32 56, %v4032_v4  ;;  %v535_v58 = vpack.c.bf16 %v444_v39, %v446_v1 }
  0x27   : > { %3340 = vmatprep.mubr.msk.bf16.mxu0 %vm583_vm0, %v555_v13  ;;  %3353 = vmatpush3.bf16.msra.mxu0 %v3783_v53  ;;  %v4230_v53 = vsel %vm429_vm1, %v5234_v34, %v5233_v40  ;;  %v556_v13 = vpack.c.bf16 %v4147_v48, %v4140_v43  ;;  %v4248_v40 = vsel %vm429_vm1, %v418_v44, %v5235_v46  ;;  %v293_v34 = vand.u32 15, %v201_v17 }
  0x28   : > { %3354 = vmatprep.subr.bf16.mxu0 %v3784_v12  ;;  %v450_v27 = vsel %vm4220_vm6, %v4230_v53, 0.0  ;;  %v4260_v46 = vadd.s32 40, %v4032_v4  ;;  %v452_v28 = vsel %vm4238_vm7, %v4248_v40, 0.0  ;;  %v437_v17 = vsel %vm429_vm1, %v420_v47, %v421_v51 }
  0x29   : > { %vm4288_vm10 = vcmp.ne.s32.totalorder %v293_v34, 0  ;;  %v433_v34 = vsel %vm429_vm1, %v5240_v61, %v5236_v3  ;;  %v454_v3 = vsel %vm4265_vm8, %v437_v17, 0.0  ;;  %v456_v57 = vsel %vm4284_vm9, %v4281_v2, 0.0 }
  0x2a   : > { %v244_v55 = vand.u32 15, %v4260_v46  ;;  %v202_v17 = vadd.s32 104, %v4032_v4  ;;  %v458_v2 = vsel %vm4288_vm10, %v433_v34, 0.0  ;;  %v460_v1 = vsel %vm4309_vm11, %v4320_v11, 0.0 }
  0x2b   : > { %3355 = vmatpush3.bf16.msra.mxu0 %v3784_v12  ;;  %v504_v12 = vsel %vm494_vm2, %v483_v45, %v484_v49  ;;  %v512_v40 = vsel %vm4322_vm12, %v4332_v63, 0.0  ;;  %v502_v53 = vsel %vm494_vm2, %v485_v50, %v5242_v56  ;;  %vm4372_vm15 = vcmp.ne.s32.totalorder %v272_v30, 15 }
  0x2c   : > { %3372 = vmatprep.subr.bf16.mxu0 %v4218_v14  ;;  %vm4341_vm13 = vcmp.ne.s32.totalorder %v244_v55, 15  ;;  %v286_v55 = vand.u32 15, %v200_v8  ;;  %v300_v34 = vand.u32 15, %v202_v17  ;;  %v5271_v8 = vrot.slane %v4121_v38, 1 }
  0x2d   : > { %v5274_v61 = vrot.slane %v4168_v59, 1  ;;  %v5275_v30 = vrot.slane %v4147_v48, 1  ;;  %v5296_v20 = vrot.slane %v4118_v37, 1  ;;  %v5297_v32 = vrot.slane %v4147_v48, 1 }
  0x2e   : > { %3341 = vmatmul.mubr.msk.bf16.gmra.mrb[8].mxu0 %vm583_vm0, %v556_v13  ;;  %v516_v13 = vsel %vm4341_vm13, %v504_v12, 0.0  ;;  %v500_v11 = vsel %vm494_vm2, %v5271_v8, %v5241_v62  ;;  %vm4383_vm5 = vcmp.ne.s32.totalorder %v286_v55, 15  ;;  %v5277_v12 = vrot.slane %v4052_v9, 7 }
  0x2f   : > { %3344 = vmatprep.mubr.msk.bf16.mxu0 %vm583_vm0, %v557_v18  ;;  %v258_v18 = vand.u32 15, %v4294_v33  ;;  %v498_v63 = vsel %vm494_vm2, %v5275_v30, %v5274_v61  ;;  %vm4403_vm6 = vcmp.ne.s32.totalorder %v300_v34, 15  ;;  %v5280_v61 = vrot.slane %v4177_v0, 1 }
  0x30   : > { %v5281_v30 = vrot.slane %v4171_v60, 1  ;;  %v520_v39 = vsel %vm4372_vm15, %v500_v11, 0.0  ;;  %v5283_v34 = vsel %vm4087_vm3, %v4097_v26, 0.0  ;;  %v438_v26 = vsel %vm429_vm1, %v5284_v25, %v420_v47 }
  0x31   : > { %vm4360_vm14 = vcmp.ne.s32.totalorder %v258_v18, 15  ;;  %v5276_v18 = vrot.slane %v4065_v15, 7  ;;  %v5285_v47 = vrot.slane %v4147_v48, 7  ;;  %v5290_v8 = vrot.slane %v4177_v0, 7 }
  0x32   : > { %v518_v55 = vsel %vm4360_vm14, %v502_v53, 0.0  ;;  %v496_v62 = vsel %vm494_vm2, %v5281_v30, %v5280_v61  ;;  %v522_v53 = vsel %vm4383_vm5, %v498_v63, 0.0  ;;  %v3786_v61 = vld [vmem:[%s5226_s1 + $0x48] sm:$0xff]   ;;  %v503_v9 = vsel %vm494_vm2, %v484_v49, %v485_v50 }
  0x33   : > { %v442_v17 = vsel %vm429_vm1, %v5277_v12, %v5276_v18  ;;  %v5282_v18 = vrot.slane %v4074_v19, 7  ;;  %v524_v30 = vsel %vm4403_vm6, %v496_v62, 0.0  ;;  %v436_v62 = vsel %vm429_vm1, %v421_v51, %v422_v52 }
  0x34   : > { %v536_v12 = vpack.c.bf16 %v442_v17, %v5283_v34  ;;  %v539_v11 = vpack.c.bf16 %v436_v62, %v454_v3  ;;  %v434_v63 = vsel %vm429_vm1, %v5286_v24, %v5285_v47  ;;  %v5287_v51 = vrot.slane %v4171_v60, 7 }
  0x35   : > { %v5288_v52 = vrot.slane %v4168_v59, 7  ;;  %v5289_v17 = vrot.slane %v4158_v54, 7  ;;  %v5295_v19 = vrot.slane %v4121_v38, 1  ;;  %v861_v41 = vpack.c.bf16 %v518_v55, %v503_v9 }
  0x36   : > { %3345 = vmatmul.mubr.msk.bf16.gmra.mrb[12].mxu0 %vm583_vm0, %v558_v16  ;;  %v204_v16 = vadd.s32 120, %v4032_v4  ;;  %v5298_v31 = vrot.slane %v4140_v43, 1  ;;  %v5299_v38 = vrot.slane %v4171_v60, 1  ;;  %v5300_v37 = vrot.slane %v4168_v59, 1 }
  0x37   : > { %3356 = vmatprep.mubr.msk.bf16.mxu0 %vm583_vm0, %v535_v58  ;;  %v440_v58 = vsel %vm429_vm1, %v5282_v18, %v418_v44  ;;  %v432_v3 = vsel %vm429_vm1, %v5288_v52, %v5287_v51  ;;  %v430_v18 = vsel %vm429_vm1, %v5290_v8, %v5289_v17  ;;  %v5304_v59 = vrot.slane %v4177_v0, 1  ;;  %v3792_v0 = vld [vmem:[%s5226_s1 + $0xb8] sm:$0xff]  }
  0x38   : > { %v314_v56 = vand.u32 15, %v204_v16  ;;  %v537_v44 = vpack.c.bf16 %v440_v58, %v450_v27  ;;  %v538_v27 = vpack.c.bf16 %v438_v26, %v452_v28  ;;  %v540_v28 = vpack.c.bf16 %v434_v63, %v456_v57 }
  0x39   : > { %v541_v16 = vpack.c.bf16 %v432_v3, %v458_v2  ;;  %v5291_v58 = vrot.slane %v4043_v6, 1  ;;  %v542_v2 = vpack.c.bf16 %v430_v18, %v460_v1  ;;  %v5294_v1 = vsel %vm4127_vm4, %v4137_v42, 0.0  ;;  %v3789_v6 = vld [vmem:[%s5226_s1 + $0xa0] sm:$0xff]  }
  0x3a   : > { %v497_v49 = vsel %vm494_vm2, %v5300_v37, %v5299_v38  ;;  %vm477_vm3 = vcmp.ne.s32.totalorder %v314_v56, 15  ;;  %3396 = vmatprep.subr.bf16.mxu1 %v3789_v6 }
  0x3b   : > { %v509_v57 = vsel %vm494_vm2, %v5291_v58, %v479_v29  ;;  %v505_v29 = vsel %vm494_vm2, %v5293_v7, %v483_v45  ;;  %v499_v45 = vsel %vm494_vm2, %v5298_v31, %v5297_v32  ;;  %v5301_v55 = vmov %v5291_v58  ;;  %3397 = vmatpush3.bf16.msra.mxu1 %v3789_v6 }
  0x3c   : > { %v858_v34 = vpack.c.bf16 %v512_v40, %v509_v57  ;;  %v863_v50 = vpack.c.bf16 %v522_v53, %v499_v45 }
  0x3e   : > { %3357 = vmatmul.mubr.msk.bf16.vlgmr.msra.gmra.mrb[0].mxu0 %vm583_vm0, %v536_v12  ;;  %v5292_v12 = vrot.slane %v4065_v15, 1  ;;  %v860_v15 = vpack.c.bf16 %v516_v13, %v505_v29  ;;  %v864_v13 = vpack.c.bf16 %v524_v30, %v497_v49  ;;  %v3790_v30 = vld [vmem:[%s5226_s1 + $0xa8] sm:$0xff]  }
  0x3f   : > { %3373 = vmatpush3.bf16.msra.mxu0 %v4218_v14  ;;  %3360 = vmatprep.mubr.msk.bf16.mxu0 %vm583_vm0, %v537_v44  ;;  %v3788_v14 = vld [vmem:[%s5226_s1 + $0x58] sm:$0xff]   ;;  %v3793_v44 = vld [vmem:[%s5226_s1 + $0xc0] sm:$0xff]  }
  0x40   : > { %3374 = vmatprep.subr.bf16.mxu0 %v3786_v61  ;;  %3398 = vmatprep.subr.bf16.mxu1 %v3790_v30 }
  0x41   : > { %3399 = vmatpush3.bf16.msra.mxu1 %v3790_v30 }
  0x43   : > { %3375 = vmatpush3.bf16.msra.mxu0 %v3786_v61  ;;  %v507_v61 = vsel %vm494_vm2, %v480_v35, %v5292_v12  ;;  %v501_v35 = vsel %vm494_vm2, %v5296_v20, %v5295_v19 }
  0x44   : > { %3376 = vmatprep.subr.bf16.mxu0 %v3787_v36  ;;  %v859_v40 = vpack.c.bf16 %v5294_v1, %v507_v61  ;;  %v862_v42 = vpack.c.bf16 %v520_v39, %v501_v35  ;;  %v5302_v39 = vrot.slane %v4158_v54, 1  ;;  %v3791_v54 = vld [vmem:[%s5226_s1 + $0xb0] sm:$0xff]  }
  0x45   : > { %3400 = vmatprep.subr.bf16.mxu1 %v3791_v54 }
  0x46   : > { %3361 = vmatmul.mubr.msk.bf16.gmra.mrb[4].mxu0 %vm583_vm0, %v538_v27  ;;  %v510_v43 = vsel %vm494_vm2, %v5302_v39, %v5301_v55  ;;  %v5303_v48 = vmov %v5302_v39  ;;  %3401 = vmatpush3.bf16.msra.mxu1 %v3791_v54 }
  0x47   : > { %3364 = vmatprep.mubr.msk.bf16.mxu0 %vm583_vm0, %v539_v11  ;;  %3377 = vmatpush3.bf16.msra.mxu0 %v3787_v36  ;;  %v495_v60 = vsel %vm494_vm2, %v5304_v59, %v5303_v48  ;;  %v526_v53 = vsel %vm477_vm3, %v510_v43, 0.0  ;;  %v4560_v36 = vld [vmem:[%s5227_s2] ss:$0 sm:$0xff] }
  0x48   : > { %3378 = vmatprep.subr.bf16.mxu0 %v3788_v14  ;;  %v865_v56 = vpack.c.bf16 %v526_v53, %v495_v60  ;;  %3402 = vmatprep.subr.bf16.mxu1 %v3792_v0 }
  0x4a   : > { %3403 = vmatpush3.bf16.msra.mxu1 %v3792_v0 }
  0x4b   : > { %3379 = vmatpush3.bf16.msra.mxu0 %v3788_v14  ;;  %3404 = vmatprep.subr.bf16.mxu1 %v3793_v44 }
  0x4e   : > { %3365 = vmatmul.mubr.msk.bf16.gmra.mrb[8].mxu0 %vm583_vm0, %v540_v28  ;;  %3405 = vmatpush3.bf16.msra.mxu1 %v3793_v44 }
  0x4f   : > { %3368 = vmatprep.mubr.msk.bf16.mxu0 %vm583_vm0, %v541_v16 }
  0x56   : > { %3369 = vmatmul.mubr.msk.bf16.gmra.mrb[12].mxu0 %vm583_vm0, %v542_v2 }
  0x57   : > { %3380 = vmatprep.mubr.msk.bf16.mxu0 %vm583_vm0, %v858_v34 }
  0x5e   : > { %3381 = vmatmul.mubr.msk.bf16.vlgmr.msra.gmra.mrb[0].mxu0 %vm583_vm0, %v859_v40 }
  0x5f   : > { %3384 = vmatprep.mubr.msk.bf16.mxu0 %vm583_vm0, %v860_v15 }
  0x66   : > { %3385 = vmatmul.mubr.msk.bf16.gmra.mrb[4].mxu0 %vm583_vm0, %v861_v41 }
  0x67   : > { %3388 = vmatprep.mubr.msk.bf16.mxu0 %vm583_vm0, %v862_v42 }
  0x6e   : > { %3389 = vmatmul.mubr.msk.bf16.gmra.mrb[8].mxu0 %vm583_vm0, %v863_v50  ;;  %v3794_v50 = vld [vmem:[%s5226_s1 + $0xc8] sm:$0xff]  }
  0x6f   : > { %3392 = vmatprep.mubr.msk.bf16.mxu0 %vm583_vm0, %v864_v13  ;;  %3406 = vmatprep.subr.bf16.mxu1 %v3794_v50 }
  0x70   : > { %3407 = vmatpush3.bf16.msra.mxu1 %v3794_v50 }
  0x76   : > { %3393 = vmatmul.mubr.msk.bf16.gmra.mrb[12].mxu0 %vm583_vm0, %v865_v56 }
 0x131   : > { %v3382_v25 = vpop.f32.mrb[0].mxu0 }
 0x132   : > { %v1034_v26 = vadd.f32 %v3382_v25, %v4560_v36  ;;  %v948_v62 = vpop.f32.mrb[1].mxu0 }
 0x133   : > { %v1032_v27 = vadd.f32 %v4560_v36, %v948_v62  ;;  %v3383_v14 = vpop.f32.mrb[2].mxu0  ;;  %v3795_v62 = vld [vmem:[%s5226_s1 + $0xd0] sm:$0xff]  }
 0x134   : > { %v1050_v11 = vmax.f32 %v1034_v26, 0.0  ;;  %v1035_v47 = vadd.f32 %v3383_v14, %v4560_v36  ;;  %v951_v24 = vpop.f32.mrb[3].mxu0  ;;  %3408 = vmatprep.subr.bf16.mxu1 %v3795_v62 }
 0x135   : > { %v1048_v63 = vmax.f32 %v1032_v27, 0.0  ;;  %v1033_v51 = vadd.f32 %v4560_v36, %v951_v24  ;;  %3409 = vmatpush3.bf16.msra.mxu1 %v3795_v62 }
 0x136   : > { %v1051_v52 = vmax.f32 %v1035_v47, 0.0  ;;  %v1066_v28 = vrot.slane %v1050_v11, 1 }
 0x137   : > { %v1049_v3 = vmax.f32 %v1033_v51, 0.0  ;;  %v4566_v17 = vrot.slane %v1048_v63, 1 }
 0x138   : > { %v1067_v16 = vrot.slane %v1051_v52, 1 }
 0x139   : > { %v1065_v8 = vrot.slane %v1049_v3, 1  ;;  %v3386_v18 = vpop.f32.mrb[4].mxu0 }
 0x13a   : > { %v1092_v58 = vsel %vm494_vm2, %v1066_v28, %v1067_v16  ;;  %v1038_v57 = vadd.f32 %v3386_v18, %v4560_v36  ;;  %v964_v2 = vpop.f32.mrb[5].mxu0  ;;  %v3796_v18 = vld [vmem:[%s5226_s1 + $0xd8] sm:$0xff]  }
 0x13b   : > { %v1098_v34 = vmax.f32 %v1050_v11, %v1092_v58  ;;  %v1093_v12 = vsel %vm494_vm2, %v1065_v8, %v1066_v28  ;;  %v1094_v61 = vsel %vm494_vm2, %v4566_v17, %v1065_v8  ;;  %v1036_v7 = vadd.f32 %v4560_v36, %v964_v2  ;;  %v3387_v29 = vpop.f32.mrb[6].mxu0  ;;  %3410 = vmatprep.subr.bf16.mxu1 %v3796_v18 }
 0x13c   : > { %v1096_v1 = vmax.f32 %v1048_v63, %v1094_v61  ;;  %v1097_v40 = vmax.f32 %v1049_v3, %v1093_v12  ;;  %v1054_v15 = vmax.f32 %v1038_v57, 0.0  ;;  %v1039_v9 = vadd.f32 %v3387_v29, %v4560_v36  ;;  %v967_v19 = vpop.f32.mrb[7].mxu0  ;;  %3411 = vmatpush3.bf16.msra.mxu1 %v3796_v18 }
 0x13d   : > { %1114 = vst [vmem:[#allocation2 + $0x10] sm:$0xff] %v1098_v34  ;;  %v1052_v20 = vmax.f32 %v1036_v7, 0.0  ;;  %v1037_v35 = vadd.f32 %v4560_v36, %v967_v19 }
 0x13e   : > { %1112 = vst [vmem:[#allocation2] sm:$0xff] %v1096_v1  ;;  %1113 = vst [vmem:[#allocation2 + $0x8] sm:$0xff] %v1097_v40  ;;  %v1055_v41 = vmax.f32 %v1039_v9, 0.0  ;;  %v1070_v31 = vrot.slane %v1054_v15, 1 }
 0x13f   : > { %v1068_v42 = vrot.slane %v1052_v20, 1  ;;  %v1053_v32 = vmax.f32 %v1037_v35, 0.0 }
 0x140   : > { %v1071_v45 = vrot.slane %v1055_v41, 1 }
 0x141   : > { %v1091_v38 = vsel %vm494_vm2, %v1067_v16, %v1068_v42  ;;  %v1069_v37 = vrot.slane %v1053_v32, 1  ;;  %v3390_v49 = vpop.f32.mrb[8].mxu0 }
 0x142   : > { %v1099_v13 = vmax.f32 %v1051_v52, %v1091_v38  ;;  %v1088_v55 = vsel %vm494_vm2, %v1070_v31, %v1071_v45  ;;  %v1042_v39 = vadd.f32 %v3390_v49, %v4560_v36  ;;  %v980_v43 = vpop.f32.mrb[9].mxu0 }
 0x143   : > { %v1102_v48 = vmax.f32 %v1054_v15, %v1088_v55  ;;  %v1089_v59 = vsel %vm494_vm2, %v1069_v37, %v1070_v31  ;;  %v1090_v60 = vsel %vm494_vm2, %v1068_v42, %v1069_v37  ;;  %v1040_v53 = vadd.f32 %v4560_v36, %v980_v43  ;;  %v3391_v56 = vpop.f32.mrb[10].mxu0  ;;  %v3797_v42 = vld [vmem:[%s5226_s1 + $0x60] sm:$0xff]  }
 0x144   : > { %1115 = vst [vmem:[#allocation2 + $0x18] sm:$0xff] %v1099_v13  ;;  %v1100_v6 = vmax.f32 %v1052_v20, %v1090_v60  ;;  %v1101_v30 = vmax.f32 %v1053_v32, %v1089_v59  ;;  %v1058_v54 = vmax.f32 %v1042_v39, 0.0  ;;  %v1043_v0 = vadd.f32 %v3391_v56, %v4560_v36  ;;  %v983_v44 = vpop.f32.mrb[11].mxu0  ;;  %3420 = vmatprep.subr.bf16.mxu1 %v3797_v42 }
 0x145   : > { %1118 = vst [vmem:[#allocation2 + $0x30] sm:$0xff] %v1102_v48  ;;  %v1056_v25 = vmax.f32 %v1040_v53, 0.0  ;;  %v1041_v26 = vadd.f32 %v4560_v36, %v983_v44  ;;  %v1128_v9 = vld [vmem:[#allocation2] ss:$2 sm:$0xff] }
 0x146   : > { %1116 = vst [vmem:[#allocation2 + $0x20] sm:$0xff] %v1100_v6  ;;  %1117 = vst [vmem:[#allocation2 + $0x28] sm:$0xff] %v1101_v30  ;;  %v1059_v27 = vmax.f32 %v1043_v0, 0.0  ;;  %v1074_v47 = vrot.slane %v1058_v54, 1 }
 0x147   : > { %v1072_v14 = vrot.slane %v1056_v25, 1  ;;  %v1057_v11 = vmax.f32 %v1041_v26, 0.0 }
 0x148   : > { %v1075_v24 = vrot.slane %v1059_v27, 1 }
 0x149   : > { %v1087_v63 = vsel %vm494_vm2, %v1071_v45, %v1072_v14  ;;  %v1073_v51 = vrot.slane %v1057_v11, 1  ;;  %v3394_v52 = vpop.f32.mrb[12].mxu0 }
 0x14a   : > { %v1103_v3 = vmax.f32 %v1055_v41, %v1087_v63  ;;  %v1084_v28 = vsel %vm494_vm2, %v1074_v47, %v1075_v24  ;;  %v1046_v16 = vadd.f32 %v3394_v52, %v4560_v36  ;;  %v996_v8 = vpop.f32.mrb[13].mxu0 }
 0x14b   : > { %v1106_v58 = vmax.f32 %v1058_v54, %v1084_v28  ;;  %v1085_v57 = vsel %vm494_vm2, %v1073_v51, %v1074_v47  ;;  %v1086_v2 = vsel %vm494_vm2, %v1072_v14, %v1073_v51  ;;  %v1044_v34 = vadd.f32 %v4560_v36, %v996_v8  ;;  %v3395_v12 = vpop.f32.mrb[14].mxu0  ;;  %v1130_v61 = vld [vmem:[#allocation2 + $0x10] ss:$2 sm:$0xff] }
 0x14c   : > { %1119 = vst [vmem:[#allocation2 + $0x38] sm:$0xff] %v1103_v3  ;;  %v1104_v7 = vmax.f32 %v1056_v25, %v1086_v2  ;;  %v1105_v29 = vmax.f32 %v1057_v11, %v1085_v57  ;;  %v1062_v1 = vmax.f32 %v1046_v16, 0.0  ;;  %v1047_v40 = vadd.f32 %v3395_v12, %v4560_v36  ;;  %v999_v15 = vpop.f32.mrb[15].mxu0  ;;  %v3798_v16 = vld [vmem:[%s5226_s1 + $0x68] sm:$0xff]   ;;  %v3799_v57 = vld [vmem:[%s5226_s1 + $0x70] sm:$0xff]  }
 0x14d   : > { %1122 = vst [vmem:[#allocation2 + $0x50] sm:$0xff] %v1106_v58  ;;  %v1060_v19 = vmax.f32 %v1044_v34, 0.0  ;;  %v1045_v20 = vadd.f32 %v4560_v36, %v999_v15  ;;  %v3747_v35 = vpack.i.bf16 %v1130_v61, %v1128_v9  ;;  %v1132_v59 = vld [vmem:[#allocation2 + $0x20] ss:$2 sm:$0xff]  ;;  %v3800_v15 = vld [vmem:[%s5226_s1 + $0x78] sm:$0xff]  }
 0x14e   : > { %1120 = vst [vmem:[#allocation2 + $0x40] sm:$0xff] %v1104_v7  ;;  %1121 = vst [vmem:[#allocation2 + $0x48] sm:$0xff] %v1105_v29  ;;  %v1063_v41 = vmax.f32 %v1047_v40, 0.0  ;;  %v1078_v45 = vrot.slane %v1062_v1, 1  ;;  %v1178_v7 = vand.u32 7, %v4236_v21 }
 0x14f   : > { %v1076_v32 = vrot.slane %v1060_v19, 1  ;;  %v1061_v31 = vmax.f32 %v1045_v20, 0.0  ;;  %3748 = vrot.lane.b32.xlu0 %v3747_v35, %s3949_s10 }
 0x150   : > { %v1079_v38 = vrot.slane %v1063_v41, 1  ;;  %vm1264_vm4 = vcmp.ne.s32.totalorder %v1178_v7, 0  ;;  %vm1296_vm6 = vcmp.ne.s32.totalorder %v1178_v7, 7  ;;  %v3809_v7 = vld [vmem:[%s5226_s1 + $0x100] sm:$0xff]  }
 0x151   : > { %v1083_v36 = vsel %vm494_vm2, %v1075_v24, %v1076_v32  ;;  %v1077_v37 = vrot.slane %v1061_v31, 1 }
 0x152   : > { %v1107_v49 = vmax.f32 %v1059_v27, %v1083_v36  ;;  %v1080_v50 = vsel %vm494_vm2, %v1078_v45, %v1079_v38  ;;  %v1095_v13 = vsel %vm494_vm2, %v1079_v38, %v4566_v17  ;;  %v3802_v36 = vld [vmem:[%s5226_s1 + $0x88] sm:$0xff]  }
 0x153   : > { %v1110_v55 = vmax.f32 %v1062_v1, %v1080_v50  ;;  %v1111_v39 = vmax.f32 %v1063_v41, %v1095_v13  ;;  %v1081_v43 = vsel %vm494_vm2, %v1077_v37, %v1078_v45  ;;  %v1082_v48 = vsel %vm494_vm2, %v1076_v32, %v1077_v37  ;;  %v1134_v60 = vld [vmem:[#allocation2 + $0x30] ss:$2 sm:$0xff]  ;;  %v3801_v32 = vld [vmem:[%s5226_s1 + $0x80] sm:$0xff]  }
 0x154   : > { %1123 = vst [vmem:[#allocation2 + $0x58] sm:$0xff] %v1107_v49  ;;  %v1108_v53 = vmax.f32 %v1060_v19, %v1082_v48  ;;  %v1109_v56 = vmax.f32 %v1061_v31, %v1081_v43  ;;  %v3752_v6 = vpack.i.bf16 %v1134_v60, %v1132_v59  ;;  %v3803_v37 = vld [vmem:[%s5226_s1 + $0x90] sm:$0xff]   ;;  %v3804_v49 = vld [vmem:[%s5226_s1 + $0x98] sm:$0xff]   ;;  %v1185_v50 = vand.u32 7, %v4040_v5 }
 0x155   : > { %1126 = vst [vmem:[#allocation2 + $0x70] sm:$0xff] %v1110_v55  ;;  %1127 = vst [vmem:[#allocation2 + $0x78] sm:$0xff] %v1111_v39  ;;  %v1136_v17 = vld [vmem:[#allocation2 + $0x40] ss:$2 sm:$0xff]  ;;  %v1192_v13 = vand.u32 7, %v4055_v10  ;;  %v1199_v43 = vand.u32 7, %v4081_v22 }
 0x156   : > { %1124 = vst [vmem:[#allocation2 + $0x60] sm:$0xff] %v1108_v53  ;;  %1125 = vst [vmem:[#allocation2 + $0x68] sm:$0xff] %v1109_v56  ;;  %3753 = vrot.lane.b32.xlu0 %v3752_v6, %s3949_s10  ;;  %v1206_v48 = vand.u32 7, %v4260_v46  ;;  %vm4698_vm8 = vcmp.ne.s32.totalorder %v1185_v50, 0  ;;  %v3805_v6 = vld [vmem:[%s5226_s1 + $0xe0] sm:$0xff]  }
 0x157   : > { %vm4704_vm9 = vcmp.ne.s32.totalorder %v1192_v13, 0  ;;  %vm4717_vm10 = vcmp.ne.s32.totalorder %v1199_v43, 0 }
 0x158   : > { %vm4723_vm11 = vcmp.ne.s32.totalorder %v1206_v48, 0  ;;  %vm3046_vm12 = vmpackc.low %vm4704_vm9, %vm4698_vm8  ;;  %vm1299_vm8 = vcmp.ne.s32.totalorder %v1199_v43, 7  ;;  %vm1300_vm9 = vcmp.ne.s32.totalorder %v1206_v48, 7 }
 0x159   : > { %vm3049_vm13 = vmpackc.low %vm4723_vm11, %vm4717_vm10 }
 0x15a   : > { %vm3069_vm11 = vmpackc.low %vm1300_vm9, %vm1299_vm8 }
 0x15b   : > { %v1138_v30 = vld [vmem:[#allocation2 + $0x50] ss:$2 sm:$0xff] }
 0x15c   : > { %v3757_v54 = vpack.i.bf16 %v1138_v30, %v1136_v17  ;;  %v1142_v44 = vld [vmem:[#allocation2 + $0x70] ss:$2 sm:$0xff] }
 0x15d   : > { %v1140_v0 = vld [vmem:[#allocation2 + $0x60] ss:$2 sm:$0xff] }
 0x15e   : > { %3758 = vrot.lane.b32.xlu1 %v3757_v54, %s3949_s10  ;;  %v3762_v25 = vpack.i.bf16 %v1142_v44, %v1140_v0 }
 0x162   : > { %3763 = vrot.lane.b32.xlu1 %v3762_v25, %s3949_s10 }
 0x1c1   : > { %v3749_v26 = vpop.permute.xlu0 %3748 }
 0x1c2   : > { %v3751_v62 = vunpack.i.h.bf16 %v3749_v26  ;;  %v3750_v27 = vunpack.i.l.bf16 %v3749_v26 }
 0x1c4   : > { %v4630_v14 = vmax.f32 %v1130_v61, %v3751_v62  ;;  %v4632_v11 = vmax.f32 %v1128_v9, %v3750_v27  ;;  %v1171_v61 = vand.u32 7, %v4032_v4  ;;  %v3806_v62 = vld [vmem:[%s5226_s1 + $0xe8] sm:$0xff]   ;;  %v1213_v27 = vand.u32 7, %v4084_v23  ;;  %v3815_v23 = vld [vmem:[%s5226_s1 + $0x170] sm:$0xff]  }
 0x1c6   : > { %v1363_v47 = vpack.c.bf16 %v4630_v14, %v4632_v11  ;;  %v1272_v9 = vrot.slane %v4630_v14, 7  ;;  %v1271_v19 = vrot.slane %v4632_v11, 7  ;;  %vm1263_vm0 = vcmp.ne.s32.totalorder %v1171_v61, 0 }
 0x1c7   : > { %vm3043_vm7 = vmpackc.low %vm1264_vm4, %vm1263_vm0  ;;  %vm4750_vm14 = vcmp.ne.s32.totalorder %v1213_v27, 0  ;;  %vm1295_vm5 = vcmp.ne.s32.totalorder %v1171_v61, 7  ;;  %vm1297_vm4 = vcmp.ne.s32.totalorder %v1185_v50, 7  ;;  %v3819_v50 = vld [vmem:[%s5226_s1 + $0x190] sm:$0xff]  }
 0x1c8   : > { %v3754_v24 = vpop.permute.xlu0 %3753  ;;  %3412 = vmatprep.mubr.bf16.mxu1 %v1363_v47  ;;  %v1285_v31 = vsel %vm429_vm1, %v1271_v19, %v1272_v9  ;;  %v1220_v47 = vand.u32 7, %v4294_v33  ;;  %vm3063_vm0 = vmpackc.low %vm1296_vm6, %vm1295_vm5 }
 0x1c9   : > { %v3756_v63 = vunpack.i.h.bf16 %v3754_v24  ;;  %v3755_v51 = vunpack.i.l.bf16 %v3754_v24 }
 0x1ca   : > { %vm4754_vm15 = vcmp.ne.s32.totalorder %v1220_v47, 0 }
 0x1cb   : > { %v4636_v52 = vmax.f32 %v1134_v60, %v3756_v63  ;;  %v4638_v3 = vmax.f32 %v1132_v59, %v3755_v51  ;;  %vm3052_vm3 = vmpackc.low %vm4754_vm15, %vm4750_vm14 }
 0x1cd   : > { %v1364_v28 = vpack.c.bf16 %v4636_v52, %v4638_v3  ;;  %v1274_v55 = vrot.slane %v4636_v52, 7  ;;  %v1273_v39 = vrot.slane %v4638_v3, 7  ;;  %v1305_v51 = vrot.slane %v4638_v3, 1  ;;  %v3807_v3 = vld [vmem:[%s5226_s1 + $0xf0] sm:$0xff]  }
 0x1cf   : > { %3413 = vmatmul.mubr.bf16.vlgmr.msra.gmra.mrb[0].mxu1 %v1364_v28  ;;  %v1304_v28 = vrot.slane %v4630_v14, 1 }
 0x1d0   : > { %v3759_v8 = vpop.permute.xlu1 %3758  ;;  %3421 = vmatpush3.bf16.msra.mxu1 %v3797_v42 }
 0x1d1   : > { %v3761_v18 = vunpack.i.h.bf16 %v3759_v8  ;;  %v3760_v58 = vunpack.i.l.bf16 %v3759_v8  ;;  %3422 = vmatprep.subr.bf16.mxu1 %v3798_v16 }
 0x1d3   : > { %v4648_v2 = vmax.f32 %v1138_v30, %v3761_v18  ;;  %v4650_v34 = vmax.f32 %v1136_v17, %v3760_v58  ;;  %v1283_v17 = vsel %vm429_vm1, %v1273_v39, %v1274_v55  ;;  %v1284_v30 = vsel %vm429_vm1, %v1272_v9, %v1273_v39 }
 0x1d4   : > { %v3764_v12 = vpop.permute.xlu1 %3763  ;;  %3423 = vmatpush3.bf16.msra.mxu1 %v3798_v16  ;;  %v3047_v26 = vpack.c.bf16 %v1283_v17, %v1284_v30  ;;  %v1303_v16 = vrot.slane %v4632_v11, 1  ;;  %v1316_v18 = vsel %vm494_vm2, %v1304_v28, %v1305_v51 }
 0x1d5   : > { %v3766_v29 = vunpack.i.h.bf16 %v3764_v12  ;;  %v3765_v1 = vunpack.i.l.bf16 %v3764_v12  ;;  %3424 = vmatprep.subr.bf16.mxu1 %v3799_v57  ;;  %v1365_v40 = vpack.c.bf16 %v4648_v2, %v4650_v34  ;;  %v1276_v59 = vrot.slane %v4648_v2, 7  ;;  %v3808_v12 = vld [vmem:[%s5226_s1 + $0xf8] sm:$0xff]  }
 0x1d6   : > { %v1275_v60 = vrot.slane %v4650_v34, 7 }
 0x1d7   : > { %v4661_v20 = vmax.f32 %v1142_v44, %v3766_v29  ;;  %v4663_v35 = vmax.f32 %v1140_v0, %v3765_v1  ;;  %3416 = vmatprep.mubr.bf16.mxu1 %v1365_v40  ;;  %v3810_v29 = vld [vmem:[%s5226_s1 + $0x108] sm:$0xff]   ;;  %v3811_v1 = vld [vmem:[%s5226_s1 + $0x110] sm:$0xff]   ;;  %v3812_v40 = vld [vmem:[%s5226_s1 + $0x118] sm:$0xff]  }
 0x1d8   : > { %3425 = vmatpush3.bf16.msra.mxu1 %v3799_v57  ;;  %v1281_v44 = vsel %vm429_vm1, %v1275_v60, %v1276_v59  ;;  %v1282_v25 = vsel %vm429_vm1, %v1274_v55, %v1275_v60  ;;  %v1317_v57 = vsel %vm494_vm2, %v1303_v16, %v1304_v28 }
 0x1d9   : > { %v1278_v41 = vrot.slane %v4661_v20, 7  ;;  %3426 = vmatprep.subr.bf16.mxu1 %v3800_v15  ;;  %v1366_v42 = vpack.c.bf16 %v4661_v20, %v4663_v35  ;;  %v1277_v24 = vrot.slane %v4663_v35, 7  ;;  %v3050_v63 = vpack.c.bf16 %v1281_v44, %v1282_v25 }
 0x1da   : > { %v3064_v61 = vpack.c.bf16 %v1316_v18, %v1317_v57  ;;  %v1309_v9 = vrot.slane %v4663_v35, 1 }
 0x1db   : > { %v1286_v45 = vsel %vm429_vm1, %v1278_v41, %v1271_v19  ;;  %3417 = vmatmul.mubr.bf16.gmra.mrb[4].mxu1 %v1366_v42  ;;  %v1279_v14 = vsel %vm429_vm1, %v1277_v24, %v1278_v41  ;;  %v1280_v11 = vsel %vm429_vm1, %v1276_v59, %v1277_v24  ;;  %v1306_v19 = vrot.slane %v4636_v52, 1 }
 0x1dc   : > { %v3044_v38 = vpack.c.bf16 %v1285_v31, %v1286_v45  ;;  %3427 = vmatpush3.bf16.msra.mxu1 %v3800_v15  ;;  %v3053_v58 = vpack.c.bf16 %v1279_v14, %v1280_v11  ;;  %v1307_v15 = vrot.slane %v4650_v34, 1  ;;  %v1308_v41 = vrot.slane %v4648_v2, 1 }
 0x1dd   : > { %3428 = vmatprep.subr.bf16.mxu1 %v3801_v32  ;;  %v1315_v2 = vsel %vm494_vm2, %v1305_v51, %v1306_v19 }
 0x1de   : > { %3436 = vmatprep.mubr.msk.bf16.mxu1 %vm3043_vm7, %v3044_v38  ;;  %vm1298_vm7 = vcmp.ne.s32.totalorder %v1192_v13, 7  ;;  %v1314_v42 = vsel %vm494_vm2, %v1306_v19, %v1307_v15  ;;  %v1312_v52 = vsel %vm494_vm2, %v1308_v41, %v1309_v9  ;;  %v1313_v35 = vsel %vm494_vm2, %v1307_v15, %v1308_v41  ;;  %v3814_v38 = vld [vmem:[%s5226_s1 + $0x168] sm:$0xff]   ;;  %v3075_v13 = vld [vmem:[%s5227_s2 + $0x1] ss:$0 sm:$0xff] }
 0x1df   : > { %vm3066_vm10 = vmpackc.low %vm1298_vm7, %vm1297_vm4  ;;  %v3067_v34 = vpack.c.bf16 %v1314_v42, %v1315_v2  ;;  %v3070_v22 = vpack.c.bf16 %v1312_v52, %v1313_v35 }
 0x1e0   : > { %3429 = vmatpush3.bf16.msra.mxu1 %v3801_v32  ;;  %v1310_v32 = vrot.slane %v4661_v20, 1  ;;  %v3813_v20 = vld [vmem:[%s5226_s1 + $0x160] sm:$0xff]  }
 0x1e1   : > { %3430 = vmatprep.subr.bf16.mxu1 %v3802_v36  ;;  %3468 = vmatprep.subr.bf16.mxu0 %v3813_v20 }
 0x1e2   : > { %v1311_v46 = vsel %vm494_vm2, %v1309_v9, %v1310_v32  ;;  %v1318_v31 = vsel %vm494_vm2, %v1310_v32, %v1303_v16  ;;  %3469 = vmatpush3.bf16.msra.mxu0 %v3813_v20 }
 0x1e3   : > { %v3073_v45 = vpack.c.bf16 %v1318_v31, %v1311_v46  ;;  %3470 = vmatprep.subr.bf16.mxu0 %v3814_v38  ;;  %v3821_v46 = vld [vmem:[%s5226_s1 + $0x120] sm:$0xff]  }
 0x1e4   : > { %3431 = vmatpush3.bf16.msra.mxu1 %v3802_v36  ;;  %v3816_v36 = vld [vmem:[%s5226_s1 + $0x178] sm:$0xff]  }
 0x1e5   : > { %3432 = vmatprep.subr.bf16.mxu1 %v3803_v37 }
 0x1e6   : > { %3471 = vmatpush3.bf16.msra.mxu0 %v3814_v38 }
 0x1e7   : > { %3472 = vmatprep.subr.bf16.mxu0 %v3815_v23 }
 0x1e8   : > { %3433 = vmatpush3.bf16.msra.mxu1 %v3803_v37  ;;  %v3817_v37 = vld [vmem:[%s5226_s1 + $0x180] sm:$0xff]  }
 0x1e9   : > { %3434 = vmatprep.subr.bf16.mxu1 %v3804_v49 }
 0x1ea   : > { %3473 = vmatpush3.bf16.msra.mxu0 %v3815_v23 }
 0x1eb   : > { %3474 = vmatprep.subr.bf16.mxu0 %v3816_v36 }
 0x1ec   : > { %3435 = vmatpush3.bf16.msra.mxu1 %v3804_v49  ;;  %v3818_v49 = vld [vmem:[%s5226_s1 + $0x188] sm:$0xff]  }
 0x1ed   : > { %3444 = vmatprep.subr.bf16.mxu1 %v3805_v6 }
 0x1ee   : > { %3475 = vmatpush3.bf16.msra.mxu0 %v3816_v36 }
 0x1ef   : > { %3437 = vmatmul.mubr.msk.bf16.vlgmr.msra.gmra.mrb[0].mxu1 %vm3046_vm12, %v3047_v26  ;;  %vm1301_vm12 = vcmp.ne.s32.totalorder %v1213_v27, 7  ;;  %3476 = vmatprep.subr.bf16.mxu0 %v3817_v37 }
 0x1f0   : > { %3440 = vmatprep.mubr.msk.bf16.mxu1 %vm3049_vm13, %v3050_v63  ;;  %3445 = vmatpush3.bf16.msra.mxu1 %v3805_v6  ;;  %vm1302_vm13 = vcmp.ne.s32.totalorder %v1220_v47, 7 }
 0x1f1   : > { %3446 = vmatprep.subr.bf16.mxu1 %v3806_v62  ;;  %vm3072_vm14 = vmpackc.low %vm1302_vm13, %vm1301_vm12 }
 0x1f2   : > { %3477 = vmatpush3.bf16.msra.mxu0 %v3817_v37  ;;  %v3837_v37 = vld [vmem:[%s5226_s1 + $0x220] sm:$0xff]  }
 0x1f3   : > { %3478 = vmatprep.subr.bf16.mxu0 %v3818_v49 }
 0x1f4   : > { %3447 = vmatpush3.bf16.msra.mxu1 %v3806_v62 }
 0x1f5   : > { %3448 = vmatprep.subr.bf16.mxu1 %v3807_v3 }
 0x1f6   : > { %3479 = vmatpush3.bf16.msra.mxu0 %v3818_v49  ;;  %v3951_v49 = vmov 0.0  }
 0x1f7   : > { %3441 = vmatmul.mubr.msk.bf16.gmra.mrb[4].mxu1 %vm3052_vm3, %v3053_v58  ;;  %3480 = vmatprep.subr.bf16.mxu0 %v3819_v50 }
 0x1f8   : > { %3449 = vmatpush3.bf16.msra.mxu1 %v3807_v3  ;;  %3460 = vmatprep.mubr.msk.bf16.mxu1 %vm3063_vm0, %v3064_v61 }
 0x1f9   : > { %3450 = vmatprep.subr.bf16.mxu1 %v3808_v12 }
 0x1fa   : > { %3481 = vmatpush3.bf16.msra.mxu0 %v3819_v50  ;;  %v3839_v50 = vld [vmem:[%s5226_s1 + $0x228] sm:$0xff]  }
 0x1fc   : > { %3451 = vmatpush3.bf16.msra.mxu1 %v3808_v12 }
 0x1fd   : > { %3452 = vmatprep.subr.bf16.mxu1 %v3809_v7 }
 0x200   : > { %3453 = vmatpush3.bf16.msra.mxu1 %v3809_v7 }
 0x201   : > { %3454 = vmatprep.subr.bf16.mxu1 %v3810_v29 }
 0x204   : > { %3455 = vmatpush3.bf16.msra.mxu1 %v3810_v29 }
 0x205   : > { %3456 = vmatprep.subr.bf16.mxu1 %v3811_v1 }
 0x208   : > { %3457 = vmatpush3.bf16.msra.mxu1 %v3811_v1 }
 0x209   : > { %3458 = vmatprep.subr.bf16.mxu1 %v3812_v40 }
 0x20c   : > { %3459 = vmatpush3.bf16.msra.mxu1 %v3812_v40 }
 0x20d   : > { %3528 = vmatprep.subr.bf16.mxu1 %v3951_v49 }
 0x20f   : > { %3461 = vmatmul.mubr.msk.bf16.vlgmr.msra.gmra.mrb[0].mxu1 %vm3066_vm10, %v3067_v34 }
 0x210   : > { %3464 = vmatprep.mubr.msk.bf16.mxu1 %vm3069_vm11, %v3070_v22  ;;  %v3820_v22 = vld [vmem:[%s5226_s1 + $0x198] sm:$0xff]   ;;  %3529 = vmatpush3.bf16.msra.mxu1 %v3837_v37  ;;  %v3847_v37 = vld [vmem:[%s5226_s1 + $0x248] sm:$0xff]  }
 0x211   : > { %3482 = vmatprep.subr.bf16.mxu0 %v3820_v22  ;;  %3530 = vmatprep.subr.bf16.mxu1 %v3951_v49 }
 0x212   : > { %3483 = vmatpush3.bf16.msra.mxu0 %v3820_v22 }
 0x213   : > { %3488 = vmatprep.subr.bf16.mxu0 %v3821_v46 }
 0x214   : > { %3531 = vmatpush3.bf16.msra.mxu1 %v3839_v50  ;;  %v3848_v50 = vld [vmem:[%s5226_s1 + $0x2c8] sm:$0xff]  }
 0x215   : > { %3532 = vmatprep.subr.bf16.mxu1 %v3951_v49 }
 0x217   : > { %3465 = vmatmul.mubr.msk.bf16.gmra.mrb[4].mxu1 %vm3072_vm14, %v3073_v45 }
 0x2e2   : > { %v3462_v55 = vpop.f32.mrb[0].mxu1 }
 0x2e3   : > { %v1741_v39 = vadd.f32 %v3462_v55, %v3075_v13  ;;  %v1695_v43 = vpop.f32.mrb[1].mxu1  ;;  %v3843_v55 = vld [vmem:[%s5226_s1 + $0x238] sm:$0xff]  }
 0x2e4   : > { %v1739_v48 = vadd.f32 %v3075_v13, %v1695_v43  ;;  %v3463_v59 = vpop.f32.mrb[2].mxu1 }
 0x2e5   : > { %v1749_v60 = vmax.f32 %v1741_v39, 0.0  ;;  %v1742_v53 = vadd.f32 %v3463_v59, %v3075_v13  ;;  %v1698_v56 = vpop.f32.mrb[3].mxu1 }
 0x2e6   : > { %v1747_v6 = vmax.f32 %v1739_v48, 0.0  ;;  %v1740_v17 = vadd.f32 %v3075_v13, %v1698_v56 }
 0x2e7   : > { %v1750_v30 = vmax.f32 %v1742_v53, 0.0  ;;  %v1757_v0 = vrot.slane %v1749_v60, 1 }
 0x2e8   : > { %v1748_v54 = vmax.f32 %v1740_v17, 0.0  ;;  %v1755_v25 = vrot.slane %v1747_v6, 1  ;;  %v1810_v17 = vand.u32 3, %v4032_v4  ;;  %v3842_v4 = vld [vmem:[%s5226_s1 + $0x2b0] sm:$0xff]  }
 0x2e9   : > { %v1758_v44 = vrot.slane %v1750_v30, 1 }
 0x2ea   : > { %v1756_v26 = vrot.slane %v1748_v54, 1  ;;  %v3466_v62 = vpop.f32.mrb[4].mxu1  ;;  %vm1854_vm15 = vcmp.ne.s32.totalorder %v1810_v17, 0  ;;  %vm1870_vm4 = vcmp.ne.s32.totalorder %v1810_v17, 3 }
 0x2eb   : > { %v1767_v27 = vsel %vm494_vm2, %v1757_v0, %v1758_v44  ;;  %v1745_v47 = vadd.f32 %v3466_v62, %v3075_v13  ;;  %v1711_v24 = vpop.f32.mrb[5].mxu1 }
 0x2ec   : > { %v1773_v63 = vmax.f32 %v1749_v60, %v1767_v27  ;;  %v1768_v51 = vsel %vm494_vm2, %v1756_v26, %v1757_v0  ;;  %v1769_v28 = vsel %vm494_vm2, %v1755_v25, %v1756_v26  ;;  %v1743_v16 = vadd.f32 %v3075_v13, %v1711_v24  ;;  %v3467_v8 = vpop.f32.mrb[6].mxu1 }
 0x2ed   : > { %v1771_v33 = vmax.f32 %v1747_v6, %v1769_v28  ;;  %v1772_v3 = vmax.f32 %v1748_v54, %v1768_v51  ;;  %v1753_v14 = vmax.f32 %v1745_v47, 0.0  ;;  %v1746_v11 = vadd.f32 %v3467_v8, %v3075_v13  ;;  %v1714_v18 = vpop.f32.mrb[7].mxu1  ;;  %v3823_v51 = vld [vmem:[%s5226_s1 + $0x130] sm:$0xff]   ;;  %v3824_v28 = vld [vmem:[%s5226_s1 + $0x138] sm:$0xff]   ;;  %v3826_v8 = vld [vmem:[%s5226_s1 + $0x148] sm:$0xff]  }
 0x2ee   : > { %1781 = vst [vmem:[#allocation2 + $0x10] sm:$0xff] %v1773_v63  ;;  %v1751_v58 = vmax.f32 %v1743_v16, 0.0  ;;  %v1744_v57 = vadd.f32 %v3075_v13, %v1714_v18  ;;  %v3841_v13 = vld [vmem:[%s5226_s1 + $0x230] sm:$0xff]   ;;  %v3825_v16 = vld [vmem:[%s5226_s1 + $0x140] sm:$0xff]  }
 0x2ef   : > { %1779 = vst [vmem:[#allocation2] sm:$0xff] %v1771_v33  ;;  %1780 = vst [vmem:[#allocation2 + $0x8] sm:$0xff] %v1772_v3  ;;  %v1754_v12 = vmax.f32 %v1746_v11, 0.0  ;;  %v1761_v29 = vrot.slane %v1753_v14, 1  ;;  %3533 = vmatpush3.bf16.msra.mxu1 %v3841_v13  ;;  %v3827_v33 = vld [vmem:[%s5226_s1 + $0x150] sm:$0xff]   ;;  %v3828_v3 = vld [vmem:[%s5226_s1 + $0x158] sm:$0xff]  }
 0x2f0   : > { %v1759_v61 = vrot.slane %v1751_v58, 1  ;;  %v1752_v7 = vmax.f32 %v1744_v57, 0.0  ;;  %3534 = vmatprep.subr.bf16.mxu1 %v3951_v49  ;;  %v1831_v11 = vand.u32 3, %v4055_v10  ;;  %v3849_v13 = vld [vmem:[%s5226_s1 + $0x250] sm:$0xff]  }
 0x2f1   : > { %v1762_v1 = vrot.slane %v1754_v12, 1 }
 0x2f2   : > { %v1766_v40 = vsel %vm494_vm2, %v1758_v44, %v1759_v61  ;;  %v1760_v15 = vrot.slane %v1752_v7, 1  ;;  %vm4934_vm0 = vcmp.ne.s32.totalorder %v1831_v11, 0  ;;  %vm1873_vm10 = vcmp.ne.s32.totalorder %v1831_v11, 3  ;;  %v3861_v11 = vld [vmem:[%s5226_s1 + $0x260] sm:$0xff]  }
 0x2f3   : > { %v1774_v9 = vmax.f32 %v1750_v30, %v1766_v40  ;;  %v1763_v19 = vsel %vm494_vm2, %v1761_v29, %v1762_v1  ;;  %v1770_v41 = vsel %vm494_vm2, %v1762_v1, %v1755_v25  ;;  %3535 = vmatpush3.bf16.msra.mxu1 %v3843_v55  ;;  %v1817_v30 = vand.u32 3, %v4236_v21  ;;  %v3822_v21 = vld [vmem:[%s5226_s1 + $0x128] sm:$0xff]   ;;  %v3850_v55 = vld [vmem:[%s5226_s1 + $0x2d0] sm:$0xff]  }
 0x2f4   : > { %v1777_v42 = vmax.f32 %v1753_v14, %v1763_v19  ;;  %v1778_v52 = vmax.f32 %v1754_v12, %v1770_v41  ;;  %v1764_v2 = vsel %vm494_vm2, %v1760_v15, %v1761_v29  ;;  %v1765_v34 = vsel %vm494_vm2, %v1759_v61, %v1760_v15  ;;  %3536 = vmatprep.subr.bf16.mxu1 %v3951_v49  ;;  %v3831_v41 = vld [vmem:[%s5226_s1 + $0x1b0] sm:$0xff]   ;;  %v3865_v61 = vld [vmem:[%s5226_s1 + $0x280] sm:$0xff]  }
 0x2f5   : > { %1782 = vst [vmem:[#allocation2 + $0x18] sm:$0xff] %v1774_v9  ;;  %v1775_v35 = vmax.f32 %v1751_v58, %v1765_v34  ;;  %v1776_v32 = vmax.f32 %v1752_v7, %v1764_v2  ;;  %vm1855_vm5 = vcmp.ne.s32.totalorder %v1817_v30, 0  ;;  %v1824_v14 = vand.u32 3, %v4040_v5  ;;  %v3829_v5 = vld [vmem:[%s5226_s1 + $0x1a0] sm:$0xff]   ;;  %v3830_v9 = vld [vmem:[%s5226_s1 + $0x1a8] sm:$0xff]   ;;  %v3835_v34 = vld [vmem:[%s5226_s1 + $0x1d0] sm:$0xff]  }
 0x2f6   : > { %1785 = vst [vmem:[#allocation2 + $0x30] sm:$0xff] %v1777_v42  ;;  %1786 = vst [vmem:[#allocation2 + $0x38] sm:$0xff] %v1778_v52  ;;  %v1787_v31 = vld [vmem:[#allocation2] ss:$2 sm:$0xff]  ;;  %vm1871_vm7 = vcmp.ne.s32.totalorder %v1817_v30, 3  ;;  %v3832_v42 = vld [vmem:[%s5226_s1 + $0x1b8] sm:$0xff]  }
 0x2f7   : > { %1783 = vst [vmem:[#allocation2 + $0x20] sm:$0xff] %v1775_v35  ;;  %1784 = vst [vmem:[#allocation2 + $0x28] sm:$0xff] %v1776_v32  ;;  %vm4930_vm3 = vcmp.ne.s32.totalorder %v1824_v14, 0  ;;  %v3833_v52 = vld [vmem:[%s5226_s1 + $0x1c0] sm:$0xff]   ;;  %v3834_v2 = vld [vmem:[%s5226_s1 + $0x1c8] sm:$0xff]  }
 0x2f8   : > { %vm3092_vm6 = vmpackc.low %vm1855_vm5, %vm1854_vm15  ;;  %v3836_v35 = vld [vmem:[%s5226_s1 + $0x1d8] sm:$0xff]   ;;  %v3866_v7 = vld [vmem:[%s5226_s1 + $0x288] sm:$0xff]  }
 0x2f9   : > { %vm3095_vm8 = vmpackc.low %vm4934_vm0, %vm4930_vm3 }
 0x2fa   : > { %vm3106_vm9 = vmpackc.low %vm1871_vm7, %vm1870_vm4 }
 0x2fc   : > { %v1789_v45 = vld [vmem:[#allocation2 + $0x10] ss:$2 sm:$0xff] }
 0x2fd   : > { %v3767_v20 = vpack.i.bf16 %v1789_v45, %v1787_v31  ;;  %v1793_v38 = vld [vmem:[#allocation2 + $0x30] ss:$2 sm:$0xff] }
 0x2fe   : > { %v1791_v23 = vld [vmem:[#allocation2 + $0x20] ss:$2 sm:$0xff] }
 0x2ff   : > { %3768 = vrot.lane.b32.xlu0 %v3767_v20, %s3950_s7  ;;  %v3772_v36 = vpack.i.bf16 %v1793_v38, %v1791_v23  ;;  %v3840_v20 = vld [vmem:[%s5226_s1 + $0x2a8] sm:$0xff]  }
 0x301   : > { %3773 = vrot.lane.b32.xlu1 %v3772_v36, %s3950_s7  ;;  %v3846_v36 = vld [vmem:[%s5226_s1 + $0x2c0] sm:$0xff]   ;;  %s3953_s7 = smov [#allocation3]  }
 0x302   : > { %s3889_s8 = sshll.u32 %s3953_s7, 4  ;;  %s3890_s8 = int_to_ptr.vmem [resolvable:$false] %s3889_s8 }
 0x303   : > { %s3891_s9 = scalar_lea.vmem %s3890_s8, 256  ;;  %p3892_p0 = scmp.lt.s32.totalorder %s5185_s29, %s3890_s8 }
 0x304   : > { %p3893_p1 = scmp.lt.s32.totalorder %s3891_s9, %s3885_s16 }
 0x306   : > { %p3894_p2 = por %p3893_p1, %p3892_p0 }
 0x308   : > { %p3895_p3 = pnand %p3894_p2, %p3888_p13 }
 0x371   : > { %v3769_v39 = vpop.permute.xlu0 %3768 }
 0x372   : > { %v3771_v43 = vunpack.i.h.bf16 %v3769_v39  ;;  %v3770_v48 = vunpack.i.l.bf16 %v3769_v39  ;;  %v3851_v39 = vld [vmem:[%s5226_s1 + $0x258] sm:$0xff]  }
 0x373   : > { %v3774_v59 = vpop.permute.xlu1 %3773 }
 0x374   : > { %v4882_v60 = vmax.f32 %v1789_v45, %v3771_v43  ;;  %v4884_v53 = vmax.f32 %v1787_v31, %v3770_v48  ;;  %v3776_v56 = vunpack.i.h.bf16 %v3774_v59  ;;  %v3775_v6 = vunpack.i.l.bf16 %v3774_v59  ;;  %v3838_v31 = vld [vmem:[%s5226_s1 + $0x2a0] sm:$0xff]   ;;  %v3852_v43 = vld [vmem:[%s5226_s1 + $0x2d8] sm:$0xff]  }
 0x375   : > { %v3112_v48 = vld [vmem:[%s5227_s2 + $0x2] ss:$0 sm:$0xff] }
 0x376   : > { %v4888_v54 = vmax.f32 %v1793_v38, %v3776_v56  ;;  %v4890_v0 = vmax.f32 %v1791_v23, %v3775_v6  ;;  %v1920_v44 = vpack.c.bf16 %v4882_v60, %v4884_v53  ;;  %v1859_v25 = vrot.slane %v4882_v60, 7  ;;  %v3844_v38 = vld [vmem:[%s5226_s1 + $0x2b8] sm:$0xff]   ;;  %v3845_v23 = vld [vmem:[%s5226_s1 + $0x240] sm:$0xff]  }
 0x377   : > { %v1858_v26 = vrot.slane %v4884_v53, 7  ;;  %v1875_v57 = vrot.slane %v4882_v60, 1  ;;  %v1874_v12 = vrot.slane %v4884_v53, 1  ;;  %3537 = vmatpush3.bf16.msra.mxu1 %v3845_v23 }
 0x378   : > { %v1861_v62 = vrot.slane %v4888_v54, 7  ;;  %3484 = vmatprep.mubr.bf16.mxu0 %v1920_v44  ;;  %v1921_v27 = vpack.c.bf16 %v4888_v54, %v4890_v0  ;;  %v1860_v18 = vrot.slane %v4890_v0, 7  ;;  %v1876_v58 = vrot.slane %v4890_v0, 1  ;;  %3538 = vmatprep.subr.bf16.mxu1 %v3951_v49 }
 0x379   : > { %v1864_v47 = vsel %vm429_vm1, %v1858_v26, %v1859_v25  ;;  %v1880_v15 = vsel %vm494_vm2, %v1874_v12, %v1875_v57  ;;  %v1877_v32 = vrot.slane %v4888_v54, 1 }
 0x37a   : > { %3485 = vmatmul.mubr.bf16.vlgmr.msra.gmra.mrb[16].mxu0 %v1921_v27  ;;  %v1865_v24 = vsel %vm429_vm1, %v1861_v62, %v1858_v26  ;;  %v1862_v10 = vsel %vm429_vm1, %v1860_v18, %v1861_v62  ;;  %v1863_v29 = vsel %vm429_vm1, %v1859_v25, %v1860_v18  ;;  %v1879_v1 = vsel %vm494_vm2, %v1875_v57, %v1876_v58  ;;  %v3853_v27 = vld [vmem:[%s5226_s1 + $0x1e0] sm:$0xff]   ;;  %v3863_v57 = vld [vmem:[%s5226_s1 + $0x270] sm:$0xff]  }
 0x37b   : > { %3489 = vmatpush3.bf16.msra.mxu0 %v3821_v46  ;;  %v3093_v63 = vpack.c.bf16 %v1864_v47, %v1865_v24  ;;  %v3096_v40 = vpack.c.bf16 %v1862_v10, %v1863_v29  ;;  %v3107_v19 = vpack.c.bf16 %v1879_v1, %v1880_v15  ;;  %vm1872_vm1 = vcmp.ne.s32.totalorder %v1824_v14, 3  ;;  %3539 = vmatpush3.bf16.msra.mxu1 %v3847_v37  ;;  %v3868_v10 = vld [vmem:[%s5226_s1 + $0x298] sm:$0xff]   ;;  %v3870_v15 = vld [vmem:[%s5226_s1 + $0x2e8] sm:$0xff]  }
 0x37c   : > { %3490 = vmatprep.subr.bf16.mxu0 %v3822_v21  ;;  %v1881_v22 = vsel %vm494_vm2, %v1877_v32, %v1874_v12  ;;  %v1878_v46 = vsel %vm494_vm2, %v1876_v58, %v1877_v32  ;;  %vm3109_vm11 = vmpackc.low %vm1873_vm10, %vm1872_vm1  ;;  %3540 = vmatprep.subr.bf16.mxu1 %v3951_v49  ;;  %vm3952_vm2 = vmmov 0   ;;  %v3862_v58 = vld [vmem:[%s5226_s1 + $0x268] sm:$0xff]   ;;  %v3864_v12 = vld [vmem:[%s5226_s1 + $0x278] sm:$0xff]  }
 0x37d   : > { %3504 = vmatprep.mubr.msk.bf16.mxu0 %vm3092_vm6, %v3093_v63  ;;  %v3110_v45 = vpack.c.bf16 %v1881_v22, %v1878_v46  ;;  %3544 = vmatprep.mubr.msk.bf16.mxu1 %vm3952_vm2, %v3951_v49  ;;  %v3854_v63 = vld [vmem:[%s5226_s1 + $0x1e8] sm:$0xff]   ;;  %v3879_v32 = vld [vmem:[%s5226_s1 + $0x330] sm:$0xff]   ;;  %v3880_v22 = vld [vmem:[%s5226_s1 + $0x338] sm:$0xff]  }
 0x37e   : > { %v3881_v46 = vld [vmem:[%s5226_s1 + $0x340] sm:$0xff]  }
 0x37f   : > { %3491 = vmatpush3.bf16.msra.mxu0 %v3822_v21  ;;  %3541 = vmatpush3.bf16.msra.mxu1 %v3849_v13 }
 0x380   : > { %3492 = vmatprep.subr.bf16.mxu0 %v3823_v51  ;;  %3542 = vmatprep.subr.bf16.mxu1 %v3951_v49 }
 0x383   : > { %3493 = vmatpush3.bf16.msra.mxu0 %v3823_v51  ;;  %3543 = vmatpush3.bf16.msra.mxu1 %v3851_v39  ;;  %v3855_v51 = vld [vmem:[%s5226_s1 + $0x1f0] sm:$0xff]  }
 0x384   : > { %3494 = vmatprep.subr.bf16.mxu0 %v3824_v28  ;;  %3548 = vmatprep.subr.bf16.mxu1 %v3951_v49 }
 0x387   : > { %3495 = vmatpush3.bf16.msra.mxu0 %v3824_v28  ;;  %v3856_v28 = vld [vmem:[%s5226_s1 + $0x1f8] sm:$0xff]  }
 0x388   : > { %3496 = vmatprep.subr.bf16.mxu0 %v3825_v16 }
 0x38b   : > { %3497 = vmatpush3.bf16.msra.mxu0 %v3825_v16  ;;  %v3857_v16 = vld [vmem:[%s5226_s1 + $0x200] sm:$0xff]  }
 0x38c   : > { %3498 = vmatprep.subr.bf16.mxu0 %v3826_v8 }
 0x38f   : > { %3499 = vmatpush3.bf16.msra.mxu0 %v3826_v8  ;;  %v3858_v8 = vld [vmem:[%s5226_s1 + $0x208] sm:$0xff]  }
 0x390   : > { %3500 = vmatprep.subr.bf16.mxu0 %v3827_v33 }
 0x393   : > { %3501 = vmatpush3.bf16.msra.mxu0 %v3827_v33  ;;  %v3859_v33 = vld [vmem:[%s5226_s1 + $0x210] sm:$0xff]  }
 0x394   : > { %3502 = vmatprep.subr.bf16.mxu0 %v3828_v3 }
 0x397   : > { %3503 = vmatpush3.bf16.msra.mxu0 %v3828_v3  ;;  %v3860_v3 = vld [vmem:[%s5226_s1 + $0x218] sm:$0xff]  }
 0x398   : > { %3508 = vmatprep.subr.bf16.mxu0 %v3829_v5 }
 0x39a   : > { %3505 = vmatmul.mubr.msk.bf16.vlgmr.msra.gmra.mrb[16].mxu0 %vm3095_vm8, %v3096_v40  ;;  %v3869_v40 = vld [vmem:[%s5226_s1 + $0x2e0] sm:$0xff]  }
 0x39b   : > { %3509 = vmatpush3.bf16.msra.mxu0 %v3829_v5  ;;  %3524 = vmatprep.mubr.msk.bf16.mxu0 %vm3106_vm9, %v3107_v19  ;;  %v3867_v5 = vld [vmem:[%s5226_s1 + $0x290] sm:$0xff]   ;;  %v3872_v19 = vld [vmem:[%s5226_s1 + $0x2f8] sm:$0xff]  }
 0x39c   : > { %3510 = vmatprep.subr.bf16.mxu0 %v3830_v9 }
 0x39f   : > { %3511 = vmatpush3.bf16.msra.mxu0 %v3830_v9  ;;  %v3871_v9 = vld [vmem:[%s5226_s1 + $0x2f0] sm:$0xff]  }
 0x3a0   : > { %3512 = vmatprep.subr.bf16.mxu0 %v3831_v41 }
 0x3a3   : > { %3513 = vmatpush3.bf16.msra.mxu0 %v3831_v41  ;;  %v3873_v41 = vld [vmem:[%s5226_s1 + $0x300] sm:$0xff]  }
 0x3a4   : > { %3514 = vmatprep.subr.bf16.mxu0 %v3832_v42 }
 0x3a7   : > { %3515 = vmatpush3.bf16.msra.mxu0 %v3832_v42  ;;  %v3874_v42 = vld [vmem:[%s5226_s1 + $0x308] sm:$0xff]  }
 0x3a8   : > { %3516 = vmatprep.subr.bf16.mxu0 %v3833_v52 }
 0x3ab   : > { %3517 = vmatpush3.bf16.msra.mxu0 %v3833_v52  ;;  %v3875_v52 = vld [vmem:[%s5226_s1 + $0x310] sm:$0xff]  }
 0x3ac   : > { %3518 = vmatprep.subr.bf16.mxu0 %v3834_v2 }
 0x3af   : > { %3519 = vmatpush3.bf16.msra.mxu0 %v3834_v2  ;;  %v3876_v2 = vld [vmem:[%s5226_s1 + $0x318] sm:$0xff]  }
 0x3b0   : > { %3520 = vmatprep.subr.bf16.mxu0 %v3835_v34 }
 0x3b3   : > { %3521 = vmatpush3.bf16.msra.mxu0 %v3835_v34  ;;  %v3877_v34 = vld [vmem:[%s5226_s1 + $0x320] sm:$0xff]  }
 0x3b4   : > { %3522 = vmatprep.subr.bf16.mxu0 %v3836_v35 }
 0x3b7   : > { %3523 = vmatpush3.bf16.msra.mxu0 %v3836_v35  ;;  %v3878_v35 = vld [vmem:[%s5226_s1 + $0x328] sm:$0xff]  }
 0x3b8   : > { %3588 = vmatprep.subr.bf16.mxu0 %v3951_v49 }
 0x3ba   : > { %3525 = vmatmul.mubr.msk.bf16.vlgmr.msra.gmra.mrb[16].mxu0 %vm3109_vm11, %v3110_v45 }
 0x3bb   : > { %3589 = vmatpush3.bf16.msra.mxu0 %v3838_v31  ;;  %3604 = vmatprep.mubr.msk.bf16.mxu0 %vm3952_vm2, %v3951_v49  ;;  %v3882_v31 = vld [vmem:[%s5226_s1 + $0x348] sm:$0xff]  }
 0x3bc   : > { %3590 = vmatprep.subr.bf16.mxu0 %v3951_v49 }
 0x3bf   : > { %3591 = vmatpush3.bf16.msra.mxu0 %v3840_v20 }
 0x3c0   : > { %3592 = vmatprep.subr.bf16.mxu0 %v3951_v49 }
 0x3c3   : > { %3593 = vmatpush3.bf16.msra.mxu0 %v3842_v4 }
 0x3c4   : > { %3594 = vmatprep.subr.bf16.mxu0 %v3951_v49 }
 0x3c7   : > { %3595 = vmatpush3.bf16.msra.mxu0 %v3844_v38 }
 0x3c8   : > { %3596 = vmatprep.subr.bf16.mxu0 %v3951_v49 }
 0x3cb   : > { %3597 = vmatpush3.bf16.msra.mxu0 %v3846_v36 }
 0x3cc   : > { %3598 = vmatprep.subr.bf16.mxu0 %v3951_v49 }
 0x3cf   : > { %3599 = vmatpush3.bf16.msra.mxu0 %v3848_v50 }
 0x3d0   : > { %3600 = vmatprep.subr.bf16.mxu0 %v3951_v49 }
 0x3d3   : > { %3601 = vmatpush3.bf16.msra.mxu0 %v3850_v55 }
 0x3d4   : > { %3602 = vmatprep.subr.bf16.mxu0 %v3951_v49 }
 0x3d7   : > { %3603 = vmatpush3.bf16.msra.mxu0 %v3852_v43 }
 0x3d8   : > { %3628 = vmatprep.subr.bf16.mxu0 %v3951_v49 }
 0x48d   : > { %v3526_v59 = vpop.f32.mrb[16].mxu0 }
 0x48e   : > { %v2242_v60 = vadd.f32 %v3526_v59, %v3112_v48  ;;  %v2216_v53 = vpop.f32.mrb[17].mxu0 }
 0x48f   : > { %v2240_v56 = vadd.f32 %v3112_v48, %v2216_v53  ;;  %v3527_v6 = vpop.f32.mrb[18].mxu0 }
 0x490   : > { %v2246_v17 = vmax.f32 %v2242_v60, 0.0  ;;  %v2243_v30 = vadd.f32 %v3527_v6, %v3112_v48  ;;  %v2219_v54 = vpop.f32.mrb[19].mxu0 }
 0x491   : > { %v2244_v0 = vmax.f32 %v2240_v56, 0.0  ;;  %v2241_v44 = vadd.f32 %v3112_v48, %v2219_v54  ;;  %v3145_v56 = vld [vmem:[%s5227_s2 + $0x3] ss:$0 sm:$0xff] }
 0x492   : > { %2250 = vst [vmem:[#allocation2 + $0x10] sm:$0xff] %v2246_v17  ;;  %v2247_v25 = vmax.f32 %v2243_v30, 0.0 }
 0x493   : > { %2248 = vst [vmem:[#allocation2] sm:$0xff] %v2244_v0  ;;  %v2245_v26 = vmax.f32 %v2241_v44, 0.0 }
 0x494   : > { %2251 = vst [vmem:[#allocation2 + $0x18] sm:$0xff] %v2247_v25  ;;  %v3883_v25 = vld [vmem:[%s5226_s1 + $0x350] sm:$0xff]  }
 0x495   : > { %2249 = vst [vmem:[#allocation2 + $0x8] sm:$0xff] %v2245_v26  ;;  %v3884_v26 = vld [vmem:[%s5226_s1 + $0x358] sm:$0xff]  }
 0x49c   : > { %v2271_v62 = vld [vmem:[#allocation2 + $0x1] ss:$4 sm:$0xff]  ;;  %v2574_v21 = vld [vmem:[#allocation2 + $0x3] ss:$4 sm:$0xff]  ;;  %v2252_v14 = vld [vmem:[#allocation2] ss:$4 sm:$0xff] }
 0x49d   : > { %v2288_v47 = vpack.c.bf16 %v2271_v62, %v2271_v62  ;;  %v2591_v24 = vpack.c.bf16 %v2574_v21, %v2574_v21  ;;  %v2269_v18 = vpack.c.bf16 %v2252_v14, %v2252_v14  ;;  %v2466_v29 = vld [vmem:[#allocation2 + $0x2] ss:$4 sm:$0xff]  ;;  %v3146_v62 = vld [vmem:[%s5227_s2 + $0x4] ss:$0 sm:$0xff] }
 0x49e   : > { %v2483_v1 = vpack.c.bf16 %v2466_v29, %v2466_v29 }
 0x49f   : > { %3545 = vmatmul.mubr.bf16.vlgmr.msra.gmra.mrb[8].mxu1 %v2288_v47  ;;  %3605 = vmatmul.mubr.bf16.vlgmr.msra.gmra.mrb[20].mxu0 %v2591_v24 }
 0x4a0   : > { %3549 = vmatpush3.bf16.msra.mxu1 %v3853_v27  ;;  %3564 = vmatprep.mubr.msk.bf16.mxu1 %vm3952_vm2, %v3951_v49 }
 0x4a1   : > { %3550 = vmatprep.subr.bf16.mxu1 %v3951_v49  ;;  %3644 = vmatprep.mubr.msk.bf16.mxu0 %vm3952_vm2, %v3951_v49 }
 0x4a2   : > { %3629 = vmatpush3.bf16.msra.mxu0 %v3877_v34 }
 0x4a3   : > { %3630 = vmatprep.subr.bf16.mxu0 %v3951_v49 }
 0x4a4   : > { %3551 = vmatpush3.bf16.msra.mxu1 %v3854_v63 }
 0x4a5   : > { %3552 = vmatprep.subr.bf16.mxu1 %v3951_v49 }
 0x4a6   : > { %3631 = vmatpush3.bf16.msra.mxu0 %v3878_v35 }
 0x4a7   : > { %3632 = vmatprep.subr.bf16.mxu0 %v3951_v49 }
 0x4a8   : > { %3553 = vmatpush3.bf16.msra.mxu1 %v3855_v51 }
 0x4a9   : > { %3554 = vmatprep.subr.bf16.mxu1 %v3951_v49 }
 0x4aa   : > { %3633 = vmatpush3.bf16.msra.mxu0 %v3879_v32 }
 0x4ab   : > { %3634 = vmatprep.subr.bf16.mxu0 %v3951_v49 }
 0x4ac   : > { %3555 = vmatpush3.bf16.msra.mxu1 %v3856_v28 }
 0x4ad   : > { %3556 = vmatprep.subr.bf16.mxu1 %v3951_v49 }
 0x4ae   : > { %3635 = vmatpush3.bf16.msra.mxu0 %v3880_v22 }
 0x4af   : > { %3636 = vmatprep.subr.bf16.mxu0 %v3951_v49 }
 0x4b0   : > { %3557 = vmatpush3.bf16.msra.mxu1 %v3857_v16 }
 0x4b1   : > { %3558 = vmatprep.subr.bf16.mxu1 %v3951_v49 }
 0x4b2   : > { %3637 = vmatpush3.bf16.msra.mxu0 %v3881_v46 }
 0x4b3   : > { %3638 = vmatprep.subr.bf16.mxu0 %v3951_v49 }
 0x4b4   : > { %3559 = vmatpush3.bf16.msra.mxu1 %v3858_v8 }
 0x4b5   : > { %3560 = vmatprep.subr.bf16.mxu1 %v3951_v49 }
 0x4b6   : > { %3639 = vmatpush3.bf16.msra.mxu0 %v3882_v31 }
 0x4b7   : > { %3640 = vmatprep.subr.bf16.mxu0 %v3951_v49 }
 0x4b8   : > { %3561 = vmatpush3.bf16.msra.mxu1 %v3859_v33 }
 0x4b9   : > { %3562 = vmatprep.subr.bf16.mxu1 %v3951_v49 }
 0x4ba   : > { %3641 = vmatpush3.bf16.msra.mxu0 %v3883_v25 }
 0x4bb   : > { %3642 = vmatprep.subr.bf16.mxu0 %v3951_v49 }
 0x4bc   : > { %3563 = vmatpush3.bf16.msra.mxu1 %v3860_v3 }
 0x4bd   : > { %3568 = vmatprep.subr.bf16.mxu1 %v3951_v49 }
 0x4be   : > { %3643 = vmatpush3.bf16.msra.mxu0 %v3884_v26 }
 0x4bf   : > { %3565 = vmatmul.mubr.bf16.vlgmr.msra.gmra.mrb[12].mxu1 %v2269_v18 }
 0x4c0   : > { %3569 = vmatpush3.bf16.msra.mxu1 %v3861_v11  ;;  %3584 = vmatprep.mubr.msk.bf16.mxu1 %vm3952_vm2, %v3951_v49 }
 0x4c1   : > { %3570 = vmatprep.subr.bf16.mxu1 %v3951_v49 }
 0x4c4   : > { %3571 = vmatpush3.bf16.msra.mxu1 %v3862_v58 }
 0x4c5   : > { %3572 = vmatprep.subr.bf16.mxu1 %v3951_v49 }
 0x4c8   : > { %3573 = vmatpush3.bf16.msra.mxu1 %v3863_v57 }
 0x4c9   : > { %3574 = vmatprep.subr.bf16.mxu1 %v3951_v49 }
 0x4cc   : > { %3575 = vmatpush3.bf16.msra.mxu1 %v3864_v12 }
 0x4cd   : > { %3576 = vmatprep.subr.bf16.mxu1 %v3951_v49 }
 0x4d0   : > { %3577 = vmatpush3.bf16.msra.mxu1 %v3865_v61 }
 0x4d1   : > { %3578 = vmatprep.subr.bf16.mxu1 %v3951_v49 }
 0x4d4   : > { %3579 = vmatpush3.bf16.msra.mxu1 %v3866_v7 }
 0x4d5   : > { %3580 = vmatprep.subr.bf16.mxu1 %v3951_v49 }
 0x4d8   : > { %3581 = vmatpush3.bf16.msra.mxu1 %v3867_v5 }
 0x4d9   : > { %3582 = vmatprep.subr.bf16.mxu1 %v3951_v49 }
 0x4dc   : > { %3583 = vmatpush3.bf16.msra.mxu1 %v3868_v10 }
 0x4dd   : > { %3608 = vmatprep.subr.bf16.mxu1 %v3951_v49 }
 0x4df   : > { %3585 = vmatmul.mubr.bf16.vlgmr.msra.gmra.mrb[16].mxu1 %v2483_v1 }
 0x4e0   : > { %3624 = vmatprep.mubr.msk.bf16.mxu1 %vm3952_vm2, %v3951_v49  ;;  %3609 = vmatpush3.bf16.msra.mxu1 %v3869_v40 }
 0x4e1   : > { %3610 = vmatprep.subr.bf16.mxu1 %v3951_v49 }
 0x4e4   : > { %3611 = vmatpush3.bf16.msra.mxu1 %v3870_v15 }
 0x4e5   : > { %3612 = vmatprep.subr.bf16.mxu1 %v3951_v49 }
 0x4e8   : > { %3613 = vmatpush3.bf16.msra.mxu1 %v3871_v9 }
 0x4e9   : > { %3614 = vmatprep.subr.bf16.mxu1 %v3951_v49 }
 0x4ec   : > { %3615 = vmatpush3.bf16.msra.mxu1 %v3872_v19 }
 0x4ed   : > { %3616 = vmatprep.subr.bf16.mxu1 %v3951_v49 }
 0x4f0   : > { %3617 = vmatpush3.bf16.msra.mxu1 %v3873_v41 }
 0x4f1   : > { %3618 = vmatprep.subr.bf16.mxu1 %v3951_v49 }
 0x4f4   : > { %3619 = vmatpush3.bf16.msra.mxu1 %v3874_v42 }
 0x4f5   : > { %3620 = vmatprep.subr.bf16.mxu1 %v3951_v49 }
 0x4f8   : > { %3621 = vmatpush3.bf16.msra.mxu1 %v3875_v52 }
 0x4f9   : > { %3622 = vmatprep.subr.bf16.mxu1 %v3951_v49  ;;  %v3155_v49 = vld [vmem:[%s5227_s2 + $0x5] ss:$0 sm:$0xff] }
 0x4fc   : > { %3623 = vmatpush3.bf16.msra.mxu1 %v3876_v2 }
 0x572   : > { %v2371_v45 = vpop.f32.mrb[8].mxu1  ;;  %v2674_v20 = vpop.f32.mrb[20].mxu0 }
 0x573   : > { %v3546_v4 = vpop.f32.mrb[9].mxu1  ;;  %v3606_v38 = vpop.f32.mrb[21].mxu0 }
 0x574   : > { %v2374_v23 = vpop.f32.mrb[10].mxu1  ;;  %v2677_v36 = vpop.f32.mrb[22].mxu0 }
 0x575   : > { %v3547_v37 = vpop.f32.mrb[11].mxu1  ;;  %v3607_v50 = vpop.f32.mrb[23].mxu0 }
 0x592   : > { %v2459_v13 = vpop.f32.mrb[12].mxu1 }
 0x593   : > { %v2460_v55 = vadd.f32 %v2459_v13, %v2371_v45  ;;  %v3566_v39 = vpop.f32.mrb[13].mxu1 }
 0x594   : > { %v2462_v43 = vpop.f32.mrb[14].mxu1 }
 0x595   : > { %v3567_v48 = vpop.f32.mrb[15].mxu1 }
 0x5b2   : > { %v2566_v59 = vpop.f32.mrb[16].mxu1 }
 0x5b3   : > { %v2572_v60 = vadd.f32 %v2566_v59, %v2460_v55  ;;  %v3586_v53 = vpop.f32.mrb[17].mxu1 }
 0x5b4   : > { %v2569_v6 = vpop.f32.mrb[18].mxu1 }
 0x5b5   : > { %v2680_v17 = vadd.f32 %v2674_v20, %v2572_v60  ;;  %v3587_v30 = vpop.f32.mrb[19].mxu1 }
 0x5b7   : > { %v2686_v54 = vadd.f32 %v3145_v56, %v2680_v17 }
 0x5b9   : > { %v2687_v0 = vmax.f32 %v2686_v54, 0.0 }
 0x5bb   : > { %v2704_v44 = vpack.c.bf16 %v2687_v0, %v2687_v0 }
 0x5bd   : > { %3625 = vmatmul.mubr.bf16.vlgmr.msra.gmra.mrb[20].mxu1 %v2704_v44 }
 0x690   : > { %v2792_v27 = vpop.f32.mrb[20].mxu1 }
 0x691   : > { %v2793_v21 = vadd.f32 %v3146_v62, %v2792_v27  ;;  %v3626_v47 = vpop.f32.mrb[21].mxu1 }
 0x692   : > { %v2795_v24 = vpop.f32.mrb[22].mxu1 }
 0x693   : > { %v2798_v63 = vmax.f32 %v2793_v21, 0.0  ;;  %v3627_v51 = vpop.f32.mrb[23].mxu1 }
 0x695   : > { %v2815_v28 = vpack.c.bf16 %v2798_v63, %v2798_v63 }
 0x697   : > { %3645 = vmatmul.mubr.bf16.vlgmr.msra.gmra.mrb[24].mxu0 %v2815_v28 }
 0x76a   : > { %v2903_v16 = vpop.f32.mrb[24].mxu0 }
 0x76b   : > { %v2904_v8 = vadd.f32 %v3155_v49, %v2903_v16  ;;  %v3646_v33 = vpop.f32.mrb[25].mxu0 }
 0x76c   : > { %v2906_v3 = vpop.f32.mrb[26].mxu0 }
 0x76d   : > { %2909 = vst [vmem:[%s164_s28] sm:$0xff] %v2904_v8  ;;  %v3647_v14 = vpop.f32.mrb[27].mxu0 }
 0x76e   : > { %3898 = shalt.err (!%p3895_p3)
}
 0x76f   : > { %s3899_s10 = scalar_lea.hbm %s5183_s5, 128  ;;  %s3903_s19 = scalar_lea.hbm %s5228_s3, 256 }
 0x770   : > { %p3900_p4 = scmp.ne.s32.totalorder %s5183_s5, %s3899_s10  ;;  %p3904_p9 = scmp.lt.u32.totalorder %s5183_s5, %s5228_s3 }
 0x771   : > { %p3905_p10 = scmp.lt.u32.totalorder %s3903_s19, %s3899_s10  ;;  %p3907_p12 = scmp.lt.u32.totalorder %s3899_s10, %s5183_s5 }
 0x772   : > { %p3901_p7 = pnand %p3900_p4, %p4012_p5 }
 0x773   : > { %p3906_p11 = por %p3905_p10, %p3904_p9 }
 0x774   : > { %p3902_p8 = pneg %p3901_p7 }
 0x775   : > { %p3908_p13 = por %p3907_p12, %p3906_p11 }
 0x777   : > { %p3909_p0 = pnand %p3908_p13, %p3902_p8 }
 0x779   : > { %3912 = shalt.err (!%p3909_p0)
}
 0x77a   : > { %3704 = dma.vmem_to_hbm [thread:$0]  (%p4012_p5), %s5185_s29, 128, %s5183_s5, %s2911_s6  }
 0x77b PF: > { %p3710_p1 = scmp.ge.s32.totalorder %s3947_s15, 2  ;;  %s2936_s25 = sand.u32 1, %s3935_s12  }
 0x77c   : > { %s2937_s26 = scalar_lea.sflag [#allocation4], %s2936_s25 }
 0x77d   : > { %p3707_p2 = pnand %p3710_p1, %p4016_p6 }
 0x77f   : > { %3930 = dma.done.wait (!%p3707_p2), %s2937_s26, 128  }
 0x780   : > { %3932 = vsyncadd (!%p3707_p2), %s2937_s26, 4294967168  ;;  %p13_p3 = scmp.ge.s32.totalorder %s3999_s18, 4   ;;  %s5321_s12 = smov %s3939_s13 }
 0x781   : > { %s5322_s13 = smov %s3943_s14  ;;  %s5323_s14 = smov %s4010_s21 }
 0x782   : > { %s5324_s15 = smov %s3999_s18  ;;  %15 = sbr.rel (!%p13_p3) target bundleno = 3 (0x3), region = 80 }
 0x789   :  { %2942 = vsyncpa [#allocation4], 1 }
 0x78a   :  { %2944 = vsyncpa [#allocation4 + $0x1], 1 }

</bundles_post_ra>
